<compile_context>
chip_gen: v7x
topology: tpu7x:2x2x1
jax: 0.10.0
libtpu: 0.0.40
codegen_flags: <defaults>
</compile_context>

<pallas_src>
import functools

import jax
import jax.numpy as jnp
from jax import lax
from jax.experimental import pallas as pl
from jax.experimental.pallas import tpu as pltpu


def _multi_tensorcore():
    """True when one JAX device spans two TensorCores (megacore-style sharding)."""
    try:
        kind = jax.devices()[0].device_kind.lower()
    except Exception:
        return False
    return any(tag in kind for tag in ("v4", "v5p", "v7"))


# ---------------------------------------------------------------------------
# Kernel
# ---------------------------------------------------------------------------
def _bilstm_fc_kernel(x_ref,      # (T, Bb, 2D)  merged [x_t | x_{T-1-t}] block (bf16)
                      wih_ref,    # (2D, 8H)     block-diagonal input->hidden (bf16)
                      whh_ref,    # (2H, 8H)     block-diagonal hidden->hidden (bf16)
                      b_ref,      # (1, 8H)      fused gate bias (f32)
                      wfc_ref,    # (2H, O)      FC weight, rows = [fwd H ; bwd H] (bf16)
                      bfc_ref,    # (1, O)       FC bias (f32)
                      out_ref,    # (Bb, O)      logits (f32)
                      *, seq_len):
    T = seq_len
    Bb = out_ref.shape[0]
    H8 = whh_ref.shape[1]
    H = H8 // 8
    cd = wih_ref.dtype  # bf16 compute dtype for the MXU

    # (1) Hoisted input->hidden projection: ONE well-shaped matmul for the whole
    #     sequence (fwd and bwd fused via the merged input slab + block-diagonal
    #     wih), bias folded in once. Bb is a multiple of 16, so the leading-dim
    #     merge is sublane-aligned and the per-step slices below are aligned too.
    x2 = x_ref[...].reshape(T * Bb, wih_ref.shape[0])
    z_in = (jnp.dot(x2, wih_ref[...], preferred_element_type=jnp.float32)
            + b_ref[...])                                       # (T*Bb, 8H) f32

    whh = whh_ref[...]                                          # hoisted out of the loop
    # TODO(synk): on v6e/v7x hold whh MXU weight-stationary across the unrolled steps
    # (pltpu.matmul_push_rhs once, matmul_acc_lhs/matmul_pop per step); kept as
    # jnp.dot here for portability to v5e and lowering robustness.

    # Carried state is already concatenated: [h_fwd | h_bwd], [c_fwd | c_bwd].
    h_cat = jnp.zeros((Bb, 2 * H), jnp.float32)
    c_cat = jnp.zeros((Bb, 2 * H), jnp.float32)

    # (2) Fully-unrolled fused recurrence: exactly one (Bb,2H)x(2H,8H) MXU op,
    #     one add and the gate activations per step. Forward consumes x[t];
    #     backward consumes x[T-1-t], so after the last step h_bwd equals the
    #     backward output at time 0 (== lstm_out[:, 0, H:]).
    for t in range(T):
        z = (jnp.dot(h_cat.astype(cd), whh, preferred_element_type=jnp.float32)
             + z_in[t * Bb:(t + 1) * Bb])                       # (Bb, 8H)

        gi = jax.nn.sigmoid(z[:, 0 * 2 * H:1 * 2 * H])
        gf = jax.nn.sigmoid(z[:, 1 * 2 * H:2 * 2 * H])
        gg = jnp.tanh(z[:, 2 * 2 * H:3 * 2 * H])
        go = jax.nn.sigmoid(z[:, 3 * 2 * H:4 * 2 * H])

        c_cat = gf * c_cat + gi * gg
        h_cat = go * jnp.tanh(c_cat)

    # (3) FC head: h_cat is already [h_fwd_final | h_bwd_at_t0]; no concat.
    #     (O=4 -> narrow masked store is negligible; pad O to a multiple of 128
    #      only when output_size grows.)
    out_ref[...] = (jnp.dot(h_cat.astype(cd), wfc_ref[...],
                            preferred_element_type=jnp.float32)
                    + bfc_ref[...])


# ---------------------------------------------------------------------------
# Wrapper
# ---------------------------------------------------------------------------
@jax.jit
def bilstm_classifier_forward(x, kparams):
    """x: (B, T, D) batch-first (PyTorch convention). Returns logits (B, O) f32."""
    B, T, D = x.shape
    H2, H8 = kparams["whh"].shape
    H = H8 // 8
    O = kparams["wfc"].shape[1]
    cd = kparams["wih"].dtype

    # ---- batch blocking ------------------------------------------------------
    # Pad the batch to a multiple of 16 rows (bf16 sublane tile): full-sublane
    # VPU/EUP occupancy and (8,128)-aligned static slices of z_in.
    Bp = ((B + 15) // 16) * 16

    # One block holding the whole padded batch on single-TC chips (the grid is a
    # serial loop there — more blocks just re-run the serial recurrence). Two
    # blocks only when the device spans two TensorCores and the halves stay
    # 16-row aligned.
    n_blk = 2 if (_multi_tensorcore() and Bp % 32 == 0) else 1

    # VMEM budget guard (v7x: 64 MiB physical, 32 MiB default scoped): the
    # dominant in-kernel term is the f32 z_in slab plus the 2x-buffered bf16 x
    # block. Split further only if one block would not fit comfortably.
    def blk_vmem_bytes(bb):
        return (4 * T * bb * 8 * H            # f32 z_in slab
                + 2 * 2 * T * bb * 2 * D      # double-buffered bf16 x block
                + 4 * bb * (8 * H + 4 * H))   # gate temps + h/c state (f32)

    budget = 24 << 20
    while blk_vmem_bytes(Bp // n_blk) > budget and (Bp // n_blk) % 32 == 0:
        n_blk *= 2
    b_blk = Bp // n_blk

    # ---- input prep: single relayout ------------------------------------------
    # One transpose to time-major, zero-pad the batch, build the merged
    # [x_t | x_{T-1-t}] slab. The per-core batch block is then selected purely
    # via the BlockSpec index_map (no second HBM relayout of x).
    x_tm = jnp.transpose(x, (1, 0, 2))                                  # (T, B, D)
    if Bp != B:
        x_tm = jnp.pad(x_tm, ((0, 0), (0, Bp - B), (0, 0)))
    x_merged = jnp.concatenate([x_tm, x_tm[::-1]], axis=-1).astype(cd)  # (T, Bp, 2D)

    kernel = functools.partial(_bilstm_fc_kernel, seq_len=T)

    out = pl.pallas_call(
        kernel,
        out_shape=jax.ShapeDtypeStruct((Bp, O), jnp.float32),
        grid=(n_blk,),
        in_specs=[
            pl.BlockSpec((T, b_blk, 2 * D), lambda i: (0, i, 0)),   # x batch block
            pl.BlockSpec((2 * D, H8), lambda i: (0, 0)),            # wih (shared)
            pl.BlockSpec((H2, H8), lambda i: (0, 0)),               # whh (shared)
            pl.BlockSpec((1, H8), lambda i: (0, 0)),                # gate bias
            pl.BlockSpec((H2, O), lambda i: (0, 0)),                # fc weight
            pl.BlockSpec((1, O), lambda i: (0, 0)),                 # fc bias
        ],
        out_specs=pl.BlockSpec((b_blk, O), lambda i: (i, 0)),
        compiler_params=pltpu.CompilerParams(
            dimension_semantics=("parallel",)),
    )(x_merged, kparams["wih"], kparams["whh"], kparams["b"],
      kparams["wfc"], kparams["bfc"])

    return out[:B]


# ---------------------------------------------------------------------------
# Parameter construction / packing
# ---------------------------------------------------------------------------
def init_torch_params(key, input_size, hidden_size, output_size):
    """PyTorch-layout params (shapes/gate order identical to nn.LSTM / nn.Linear)."""
    H, D, O = hidden_size, input_size, output_size
    k_lstm = float(H) ** -0.5
    k_fc = float(2 * H) ** -0.5
    keys = jax.random.split(key, 10)

    def u(k, shape, bound):
        return jax.random.uniform(k, shape, jnp.float32, -bound, bound)

    return dict(
        weight_ih_l0=u(keys[0], (4 * H, D), k_lstm),
        weight_hh_l0=u(keys[1], (4 * H, H), k_lstm),
        bias_ih_l0=u(keys[2], (4 * H,), k_lstm),
        bias_hh_l0=u(keys[3], (4 * H,), k_lstm),
        weight_ih_l0_reverse=u(keys[4], (4 * H, D), k_lstm),
        weight_hh_l0_reverse=u(keys[5], (4 * H, H), k_lstm),
        bias_ih_l0_reverse=u(keys[6], (4 * H,), k_lstm),
        bias_hh_l0_reverse=u(keys[7], (4 * H,), k_lstm),
        fc_weight=u(keys[8], (O, 2 * H), k_fc),
        fc_bias=u(keys[9], (O,), k_fc),
    )


def pack_params(tp, compute_dtype=jnp.bfloat16):
    """Rearrange PyTorch-layout params into the fused, gate-major kernel layout."""
    wih_f, whh_f = tp["weight_ih_l0"], tp["weight_hh_l0"]
    wih_b, whh_b = tp["weight_ih_l0_reverse"], tp["weight_hh_l0_reverse"]
    H = whh_f.shape[1]

    def gate_major(fwd_t, bwd_t):
        # (rows, 4H) PyTorch gate order [i,f,g,o] per direction ->
        # (rows, 8H) with columns [i_f,i_b,f_f,f_b,g_f,g_b,o_f,o_b].
        r = fwd_t.shape[0]
        return jnp.stack([fwd_t.reshape(r, 4, H), bwd_t.reshape(r, 4, H)],
                         axis=2).reshape(r, 8 * H)

    # Block-diagonal input->hidden: top D rows consume x_t (fwd gate columns),
    # bottom D rows consume x_{T-1-t} (bwd gate columns).
    wih_top = gate_major(wih_f.T, jnp.zeros_like(wih_b.T))              # (D, 8H)
    wih_bot = gate_major(jnp.zeros_like(wih_f.T), wih_b.T)              # (D, 8H)
    wih_block = jnp.concatenate([wih_top, wih_bot], axis=0)             # (2D, 8H)

    # Block-diagonal hidden->hidden: rows [h_fwd ; h_bwd].
    whh_top = gate_major(whh_f.T, jnp.zeros_like(whh_b.T))
    whh_bot = gate_major(jnp.zeros_like(whh_f.T), whh_b.T)
    whh_block = jnp.concatenate([whh_top, whh_bot], axis=0)             # (2H, 8H)

    b_f = (tp["bias_ih_l0"] + tp["bias_hh_l0"]).reshape(1, 4 * H)
    b_b = (tp["bias_ih_l0_reverse"] + tp["bias_hh_l0_reverse"]).reshape(1, 4 * H)
    b_cat = gate_major(b_f, b_b)                                        # (1, 8H)

    return dict(
        wih=wih_block.astype(compute_dtype),
        whh=whh_block.astype(compute_dtype),
        b=b_cat.astype(jnp.float32),
        wfc=tp["fc_weight"].T.astype(compute_dtype),                    # (2H, O)
        bfc=tp["fc_bias"].reshape(1, -1).astype(jnp.float32),
    )


# ---------------------------------------------------------------------------
# Pure-JAX reference (standard per-step BiLSTM, PyTorch layout) for checking.
# Matmul inputs are cast to bf16 exactly like the kernel path (f32 accumulation,
# f32 gates/state), so tolerances stay tight.
# ---------------------------------------------------------------------------
def reference_forward(x, tp, compute_dtype=jnp.bfloat16):
    H = tp["weight_hh_l0"].shape[1]

    def run_dir(xs, wih, whh, b):
        B = xs.shape[1]
        wih_t = wih.T.astype(compute_dtype)
        whh_t = whh.T.astype(compute_dtype)

        def step(carry, x_t):
            h, c = carry
            z = (jnp.dot(x_t.astype(compute_dtype), wih_t,
                         preferred_element_type=jnp.float32)
                 + jnp.dot(h.astype(compute_dtype), whh_t,
                           preferred_element_type=jnp.float32)
                 + b)
            i = jax.nn.sigmoid(z[:, 0 * H:1 * H])
            f = jax.nn.sigmoid(z[:, 1 * H:2 * H])
            g = jnp.tanh(z[:, 2 * H:3 * H])
            o = jax.nn.sigmoid(z[:, 3 * H:4 * H])
            c = f * c + i * g
            h = o * jnp.tanh(c)
            return (h, c), None

        init = (jnp.zeros((B, H), jnp.float32), jnp.zeros((B, H), jnp.float32))
        (h, _), _ = lax.scan(step, init, xs)
        return h

    x_tm = jnp.transpose(x, (1, 0, 2)).astype(jnp.float32)
    b_f = (tp["bias_ih_l0"] + tp["bias_hh_l0"]).reshape(1, 4 * H)
    b_b = (tp["bias_ih_l0_reverse"] + tp["bias_hh_l0_reverse"]).reshape(1, 4 * H)
    h_fwd = run_dir(x_tm, tp["weight_ih_l0"], tp["weight_hh_l0"], b_f)
    h_bwd = run_dir(x_tm[::-1], tp["weight_ih_l0_reverse"],
                    tp["weight_hh_l0_reverse"], b_b)
    last = jnp.concatenate([h_fwd, h_bwd], axis=1)   # cat(out[:,-1,:H], out[:,0,H:])
    return (jnp.dot(last.astype(compute_dtype), tp["fc_weight"].T.astype(compute_dtype),
                    preferred_element_type=jnp.float32)
            + tp["fc_bias"].reshape(1, -1))


if __name__ == "__main__":
    # Small shapes consistent with the module's forward:
    # batch=2, seq_len=8, input_size=16, hidden_size=32, output_size=4
    B, T, D, H, O = 2, 8, 16, 32, 4

    key = jax.random.PRNGKey(0)
    k_x, k_p = jax.random.split(key)
    x = jax.random.normal(k_x, (B, T, D), jnp.float32)

    torch_params = init_torch_params(k_p, D, H, O)
    kparams = pack_params(torch_params)

    logits = bilstm_classifier_forward(x, kparams)
    logits = jax.block_until_ready(logits)

    ref = reference_forward(x, torch_params)
    assert logits.shape == (B, O)
    assert jnp.allclose(logits, ref, atol=2e-3, rtol=2e-3), (logits, ref)

    # Model.predict() equivalent (argmax over logits) — plain JAX glue.
    _ = jnp.argmax(logits, axis=1)

    print("KERNEL_OK")
</pallas_src>

<mosaic_0001>
module attributes {stable_mosaic.version = 11 : i64} {
  func.func @_bilstm_fc_kernel(%arg0: i32, %arg1: memref<8x16x32xbf16, #tpu.memory_space<vmem>>, %arg2: memref<32x256xbf16, #tpu.memory_space<vmem>>, %arg3: memref<64x256xbf16, #tpu.memory_space<vmem>>, %arg4: memref<1x256xf32, #tpu.memory_space<vmem>>, %arg5: memref<64x4xbf16, #tpu.memory_space<vmem>>, %arg6: memref<1x4xf32, #tpu.memory_space<vmem>>, %arg7: memref<16x4xf32, #tpu.memory_space<vmem>>) attributes {dimension_semantics = [#tpu.dimension_semantics<parallel>], iteration_bounds = array<i64: 1>, scalar_prefetch = 0 : i64, scratch_operands = 0 : i64, tpu.core_type = #tpu.core_type<tc>, window_params = [{transform_indices = @transform_0, window_bounds = array<i64: 8, 16, 32>}, {pipeline_mode = #tpu.pipeline_mode<synchronous>, transform_indices = @transform_1, window_bounds = array<i64: 32, 256>}, {pipeline_mode = #tpu.pipeline_mode<synchronous>, transform_indices = @transform_2, window_bounds = array<i64: 64, 256>}, {pipeline_mode = #tpu.pipeline_mode<synchronous>, transform_indices = @transform_3, window_bounds = array<i64: 1, 256>}, {pipeline_mode = #tpu.pipeline_mode<synchronous>, transform_indices = @transform_4, window_bounds = array<i64: 64, 4>}, {pipeline_mode = #tpu.pipeline_mode<synchronous>, transform_indices = @transform_5, window_bounds = array<i64: 1, 4>}, {transform_indices = @transform_6, window_bounds = array<i64: 16, 4>}]} {
    %c0 = arith.constant 0 : index
    %c0_0 = arith.constant 0 : index
    %c0_1 = arith.constant 0 : index
    %0 = vector.load %arg1[%c0, %c0_0, %c0_1] : memref<8x16x32xbf16, #tpu.memory_space<vmem>>, vector<8x16x32xbf16>
    %1 = vector.shape_cast %0 : vector<8x16x32xbf16> to vector<128x32xbf16>
    %c0_2 = arith.constant 0 : index
    %c0_3 = arith.constant 0 : index
    %2 = vector.load %arg2[%c0_2, %c0_3] : memref<32x256xbf16, #tpu.memory_space<vmem>>, vector<32x256xbf16>
    %cst = arith.constant dense<0.000000e+00> : vector<128x256xf32>
    %3 = tpu.matmul %1, %2, %cst {dimension_numbers = #tpu.dot_dimension_numbers<[1], [0], [0], [1], [0, 0, 1, 1], [], []>} : vector<128x32xbf16>, vector<32x256xbf16>, vector<128x256xf32> -> vector<128x256xf32>
    %c0_4 = arith.constant 0 : index
    %c0_5 = arith.constant 0 : index
    %4 = vector.load %arg4[%c0_4, %c0_5] : memref<1x256xf32, #tpu.memory_space<vmem>>, vector<1x256xf32>
    %5 = vector.broadcast %4 : vector<1x256xf32> to vector<128x256xf32>
    %6 = arith.addf %3, %5 : vector<128x256xf32>
    %c0_6 = arith.constant 0 : index
    %c0_7 = arith.constant 0 : index
    %7 = vector.load %arg3[%c0_6, %c0_7] : memref<64x256xbf16, #tpu.memory_space<vmem>>, vector<64x256xbf16>
    %cst_8 = arith.constant 0.000000e+00 : f32
    %8 = vector.broadcast %cst_8 : f32 to vector<16x64xf32>
    %cst_9 = arith.constant 0.000000e+00 : f32
    %9 = vector.broadcast %cst_9 : f32 to vector<16x64xf32>
    %10 = arith.truncf %8 : vector<16x64xf32> to vector<16x64xbf16>
    %cst_10 = arith.constant dense<0.000000e+00> : vector<16x256xf32>
    %11 = tpu.matmul %10, %7, %cst_10 {dimension_numbers = #tpu.dot_dimension_numbers<[1], [0], [0], [1], [0, 0, 1, 1], [], []>} : vector<16x64xbf16>, vector<64x256xbf16>, vector<16x256xf32> -> vector<16x256xf32>
    %12 = vector.extract_strided_slice %6 {offsets = [0, 0], sizes = [16, 256], strides = [1, 1]} : vector<128x256xf32> to vector<16x256xf32>
    %13 = arith.addf %11, %12 : vector<16x256xf32>
    %14 = vector.extract_strided_slice %13 {offsets = [0, 0], sizes = [16, 64], strides = [1, 1]} : vector<16x256xf32> to vector<16x64xf32>
    %15 = arith.negf %14 : vector<16x64xf32>
    %16 = math.exp %15 : vector<16x64xf32>
    %cst_11 = arith.constant 1.000000e+00 : f32
    %17 = vector.broadcast %cst_11 : f32 to vector<16x64xf32>
    %18 = arith.addf %17, %16 : vector<16x64xf32>
    %19 = arith.divf %17, %18 : vector<16x64xf32>
    %20 = vector.extract_strided_slice %13 {offsets = [0, 64], sizes = [16, 64], strides = [1, 1]} : vector<16x256xf32> to vector<16x64xf32>
    %21 = arith.negf %20 : vector<16x64xf32>
    %22 = math.exp %21 : vector<16x64xf32>
    %cst_12 = arith.constant 1.000000e+00 : f32
    %23 = vector.broadcast %cst_12 : f32 to vector<16x64xf32>
    %24 = arith.addf %23, %22 : vector<16x64xf32>
    %25 = arith.divf %23, %24 : vector<16x64xf32>
    %26 = vector.extract_strided_slice %13 {offsets = [0, 128], sizes = [16, 64], strides = [1, 1]} : vector<16x256xf32> to vector<16x64xf32>
    %27 = math.tanh %26 : vector<16x64xf32>
    %28 = vector.extract_strided_slice %13 {offsets = [0, 192], sizes = [16, 64], strides = [1, 1]} : vector<16x256xf32> to vector<16x64xf32>
    %29 = arith.negf %28 : vector<16x64xf32>
    %30 = math.exp %29 : vector<16x64xf32>
    %cst_13 = arith.constant 1.000000e+00 : f32
    %31 = vector.broadcast %cst_13 : f32 to vector<16x64xf32>
    %32 = arith.addf %31, %30 : vector<16x64xf32>
    %33 = arith.divf %31, %32 : vector<16x64xf32>
    %34 = arith.mulf %25, %9 : vector<16x64xf32>
    %35 = arith.mulf %19, %27 : vector<16x64xf32>
    %36 = arith.addf %34, %35 : vector<16x64xf32>
    %37 = math.tanh %36 : vector<16x64xf32>
    %38 = arith.mulf %33, %37 : vector<16x64xf32>
    %39 = arith.truncf %38 : vector<16x64xf32> to vector<16x64xbf16>
    %cst_14 = arith.constant dense<0.000000e+00> : vector<16x256xf32>
    %40 = tpu.matmul %39, %7, %cst_14 {dimension_numbers = #tpu.dot_dimension_numbers<[1], [0], [0], [1], [0, 0, 1, 1], [], []>} : vector<16x64xbf16>, vector<64x256xbf16>, vector<16x256xf32> -> vector<16x256xf32>
    %41 = vector.extract_strided_slice %6 {offsets = [16, 0], sizes = [16, 256], strides = [1, 1]} : vector<128x256xf32> to vector<16x256xf32>
    %42 = arith.addf %40, %41 : vector<16x256xf32>
    %43 = vector.extract_strided_slice %42 {offsets = [0, 0], sizes = [16, 64], strides = [1, 1]} : vector<16x256xf32> to vector<16x64xf32>
    %44 = arith.negf %43 : vector<16x64xf32>
    %45 = math.exp %44 : vector<16x64xf32>
    %cst_15 = arith.constant 1.000000e+00 : f32
    %46 = vector.broadcast %cst_15 : f32 to vector<16x64xf32>
    %47 = arith.addf %46, %45 : vector<16x64xf32>
    %48 = arith.divf %46, %47 : vector<16x64xf32>
    %49 = vector.extract_strided_slice %42 {offsets = [0, 64], sizes = [16, 64], strides = [1, 1]} : vector<16x256xf32> to vector<16x64xf32>
    %50 = arith.negf %49 : vector<16x64xf32>
    %51 = math.exp %50 : vector<16x64xf32>
    %cst_16 = arith.constant 1.000000e+00 : f32
    %52 = vector.broadcast %cst_16 : f32 to vector<16x64xf32>
    %53 = arith.addf %52, %51 : vector<16x64xf32>
    %54 = arith.divf %52, %53 : vector<16x64xf32>
    %55 = vector.extract_strided_slice %42 {offsets = [0, 128], sizes = [16, 64], strides = [1, 1]} : vector<16x256xf32> to vector<16x64xf32>
    %56 = math.tanh %55 : vector<16x64xf32>
    %57 = vector.extract_strided_slice %42 {offsets = [0, 192], sizes = [16, 64], strides = [1, 1]} : vector<16x256xf32> to vector<16x64xf32>
    %58 = arith.negf %57 : vector<16x64xf32>
    %59 = math.exp %58 : vector<16x64xf32>
    %cst_17 = arith.constant 1.000000e+00 : f32
    %60 = vector.broadcast %cst_17 : f32 to vector<16x64xf32>
    %61 = arith.addf %60, %59 : vector<16x64xf32>
    %62 = arith.divf %60, %61 : vector<16x64xf32>
    %63 = arith.mulf %54, %36 : vector<16x64xf32>
    %64 = arith.mulf %48, %56 : vector<16x64xf32>
    %65 = arith.addf %63, %64 : vector<16x64xf32>
    %66 = math.tanh %65 : vector<16x64xf32>
    %67 = arith.mulf %62, %66 : vector<16x64xf32>
    %68 = arith.truncf %67 : vector<16x64xf32> to vector<16x64xbf16>
    %cst_18 = arith.constant dense<0.000000e+00> : vector<16x256xf32>
    %69 = tpu.matmul %68, %7, %cst_18 {dimension_numbers = #tpu.dot_dimension_numbers<[1], [0], [0], [1], [0, 0, 1, 1], [], []>} : vector<16x64xbf16>, vector<64x256xbf16>, vector<16x256xf32> -> vector<16x256xf32>
    %70 = vector.extract_strided_slice %6 {offsets = [32, 0], sizes = [16, 256], strides = [1, 1]} : vector<128x256xf32> to vector<16x256xf32>
    %71 = arith.addf %69, %70 : vector<16x256xf32>
    %72 = vector.extract_strided_slice %71 {offsets = [0, 0], sizes = [16, 64], strides = [1, 1]} : vector<16x256xf32> to vector<16x64xf32>
    %73 = arith.negf %72 : vector<16x64xf32>
    %74 = math.exp %73 : vector<16x64xf32>
    %cst_19 = arith.constant 1.000000e+00 : f32
    %75 = vector.broadcast %cst_19 : f32 to vector<16x64xf32>
    %76 = arith.addf %75, %74 : vector<16x64xf32>
    %77 = arith.divf %75, %76 : vector<16x64xf32>
    %78 = vector.extract_strided_slice %71 {offsets = [0, 64], sizes = [16, 64], strides = [1, 1]} : vector<16x256xf32> to vector<16x64xf32>
    %79 = arith.negf %78 : vector<16x64xf32>
    %80 = math.exp %79 : vector<16x64xf32>
    %cst_20 = arith.constant 1.000000e+00 : f32
    %81 = vector.broadcast %cst_20 : f32 to vector<16x64xf32>
    %82 = arith.addf %81, %80 : vector<16x64xf32>
    %83 = arith.divf %81, %82 : vector<16x64xf32>
    %84 = vector.extract_strided_slice %71 {offsets = [0, 128], sizes = [16, 64], strides = [1, 1]} : vector<16x256xf32> to vector<16x64xf32>
    %85 = math.tanh %84 : vector<16x64xf32>
    %86 = vector.extract_strided_slice %71 {offsets = [0, 192], sizes = [16, 64], strides = [1, 1]} : vector<16x256xf32> to vector<16x64xf32>
    %87 = arith.negf %86 : vector<16x64xf32>
    %88 = math.exp %87 : vector<16x64xf32>
    %cst_21 = arith.constant 1.000000e+00 : f32
    %89 = vector.broadcast %cst_21 : f32 to vector<16x64xf32>
    %90 = arith.addf %89, %88 : vector<16x64xf32>
    %91 = arith.divf %89, %90 : vector<16x64xf32>
    %92 = arith.mulf %83, %65 : vector<16x64xf32>
    %93 = arith.mulf %77, %85 : vector<16x64xf32>
    %94 = arith.addf %92, %93 : vector<16x64xf32>
    %95 = math.tanh %94 : vector<16x64xf32>
    %96 = arith.mulf %91, %95 : vector<16x64xf32>
    %97 = arith.truncf %96 : vector<16x64xf32> to vector<16x64xbf16>
    %cst_22 = arith.constant dense<0.000000e+00> : vector<16x256xf32>
    %98 = tpu.matmul %97, %7, %cst_22 {dimension_numbers = #tpu.dot_dimension_numbers<[1], [0], [0], [1], [0, 0, 1, 1], [], []>} : vector<16x64xbf16>, vector<64x256xbf16>, vector<16x256xf32> -> vector<16x256xf32>
    %99 = vector.extract_strided_slice %6 {offsets = [48, 0], sizes = [16, 256], strides = [1, 1]} : vector<128x256xf32> to vector<16x256xf32>
    %100 = arith.addf %98, %99 : vector<16x256xf32>
    %101 = vector.extract_strided_slice %100 {offsets = [0, 0], sizes = [16, 64], strides = [1, 1]} : vector<16x256xf32> to vector<16x64xf32>
    %102 = arith.negf %101 : vector<16x64xf32>
    %103 = math.exp %102 : vector<16x64xf32>
    %cst_23 = arith.constant 1.000000e+00 : f32
    %104 = vector.broadcast %cst_23 : f32 to vector<16x64xf32>
    %105 = arith.addf %104, %103 : vector<16x64xf32>
    %106 = arith.divf %104, %105 : vector<16x64xf32>
    %107 = vector.extract_strided_slice %100 {offsets = [0, 64], sizes = [16, 64], strides = [1, 1]} : vector<16x256xf32> to vector<16x64xf32>
    %108 = arith.negf %107 : vector<16x64xf32>
    %109 = math.exp %108 : vector<16x64xf32>
    %cst_24 = arith.constant 1.000000e+00 : f32
    %110 = vector.broadcast %cst_24 : f32 to vector<16x64xf32>
    %111 = arith.addf %110, %109 : vector<16x64xf32>
    %112 = arith.divf %110, %111 : vector<16x64xf32>
    %113 = vector.extract_strided_slice %100 {offsets = [0, 128], sizes = [16, 64], strides = [1, 1]} : vector<16x256xf32> to vector<16x64xf32>
    %114 = math.tanh %113 : vector<16x64xf32>
    %115 = vector.extract_strided_slice %100 {offsets = [0, 192], sizes = [16, 64], strides = [1, 1]} : vector<16x256xf32> to vector<16x64xf32>
    %116 = arith.negf %115 : vector<16x64xf32>
    %117 = math.exp %116 : vector<16x64xf32>
    %cst_25 = arith.constant 1.000000e+00 : f32
    %118 = vector.broadcast %cst_25 : f32 to vector<16x64xf32>
    %119 = arith.addf %118, %117 : vector<16x64xf32>
    %120 = arith.divf %118, %119 : vector<16x64xf32>
    %121 = arith.mulf %112, %94 : vector<16x64xf32>
    %122 = arith.mulf %106, %114 : vector<16x64xf32>
    %123 = arith.addf %121, %122 : vector<16x64xf32>
    %124 = math.tanh %123 : vector<16x64xf32>
    %125 = arith.mulf %120, %124 : vector<16x64xf32>
    %126 = arith.truncf %125 : vector<16x64xf32> to vector<16x64xbf16>
    %cst_26 = arith.constant dense<0.000000e+00> : vector<16x256xf32>
    %127 = tpu.matmul %126, %7, %cst_26 {dimension_numbers = #tpu.dot_dimension_numbers<[1], [0], [0], [1], [0, 0, 1, 1], [], []>} : vector<16x64xbf16>, vector<64x256xbf16>, vector<16x256xf32> -> vector<16x256xf32>
    %128 = vector.extract_strided_slice %6 {offsets = [64, 0], sizes = [16, 256], strides = [1, 1]} : vector<128x256xf32> to vector<16x256xf32>
    %129 = arith.addf %127, %128 : vector<16x256xf32>
    %130 = vector.extract_strided_slice %129 {offsets = [0, 0], sizes = [16, 64], strides = [1, 1]} : vector<16x256xf32> to vector<16x64xf32>
    %131 = arith.negf %130 : vector<16x64xf32>
    %132 = math.exp %131 : vector<16x64xf32>
    %cst_27 = arith.constant 1.000000e+00 : f32
    %133 = vector.broadcast %cst_27 : f32 to vector<16x64xf32>
    %134 = arith.addf %133, %132 : vector<16x64xf32>
    %135 = arith.divf %133, %134 : vector<16x64xf32>
    %136 = vector.extract_strided_slice %129 {offsets = [0, 64], sizes = [16, 64], strides = [1, 1]} : vector<16x256xf32> to vector<16x64xf32>
    %137 = arith.negf %136 : vector<16x64xf32>
    %138 = math.exp %137 : vector<16x64xf32>
    %cst_28 = arith.constant 1.000000e+00 : f32
    %139 = vector.broadcast %cst_28 : f32 to vector<16x64xf32>
    %140 = arith.addf %139, %138 : vector<16x64xf32>
    %141 = arith.divf %139, %140 : vector<16x64xf32>
    %142 = vector.extract_strided_slice %129 {offsets = [0, 128], sizes = [16, 64], strides = [1, 1]} : vector<16x256xf32> to vector<16x64xf32>
    %143 = math.tanh %142 : vector<16x64xf32>
    %144 = vector.extract_strided_slice %129 {offsets = [0, 192], sizes = [16, 64], strides = [1, 1]} : vector<16x256xf32> to vector<16x64xf32>
    %145 = arith.negf %144 : vector<16x64xf32>
    %146 = math.exp %145 : vector<16x64xf32>
    %cst_29 = arith.constant 1.000000e+00 : f32
    %147 = vector.broadcast %cst_29 : f32 to vector<16x64xf32>
    %148 = arith.addf %147, %146 : vector<16x64xf32>
    %149 = arith.divf %147, %148 : vector<16x64xf32>
    %150 = arith.mulf %141, %123 : vector<16x64xf32>
    %151 = arith.mulf %135, %143 : vector<16x64xf32>
    %152 = arith.addf %150, %151 : vector<16x64xf32>
    %153 = math.tanh %152 : vector<16x64xf32>
    %154 = arith.mulf %149, %153 : vector<16x64xf32>
    %155 = arith.truncf %154 : vector<16x64xf32> to vector<16x64xbf16>
    %cst_30 = arith.constant dense<0.000000e+00> : vector<16x256xf32>
    %156 = tpu.matmul %155, %7, %cst_30 {dimension_numbers = #tpu.dot_dimension_numbers<[1], [0], [0], [1], [0, 0, 1, 1], [], []>} : vector<16x64xbf16>, vector<64x256xbf16>, vector<16x256xf32> -> vector<16x256xf32>
    %157 = vector.extract_strided_slice %6 {offsets = [80, 0], sizes = [16, 256], strides = [1, 1]} : vector<128x256xf32> to vector<16x256xf32>
    %158 = arith.addf %156, %157 : vector<16x256xf32>
    %159 = vector.extract_strided_slice %158 {offsets = [0, 0], sizes = [16, 64], strides = [1, 1]} : vector<16x256xf32> to vector<16x64xf32>
    %160 = arith.negf %159 : vector<16x64xf32>
    %161 = math.exp %160 : vector<16x64xf32>
    %cst_31 = arith.constant 1.000000e+00 : f32
    %162 = vector.broadcast %cst_31 : f32 to vector<16x64xf32>
    %163 = arith.addf %162, %161 : vector<16x64xf32>
    %164 = arith.divf %162, %163 : vector<16x64xf32>
    %165 = vector.extract_strided_slice %158 {offsets = [0, 64], sizes = [16, 64], strides = [1, 1]} : vector<16x256xf32> to vector<16x64xf32>
    %166 = arith.negf %165 : vector<16x64xf32>
    %167 = math.exp %166 : vector<16x64xf32>
    %cst_32 = arith.constant 1.000000e+00 : f32
    %168 = vector.broadcast %cst_32 : f32 to vector<16x64xf32>
    %169 = arith.addf %168, %167 : vector<16x64xf32>
    %170 = arith.divf %168, %169 : vector<16x64xf32>
    %171 = vector.extract_strided_slice %158 {offsets = [0, 128], sizes = [16, 64], strides = [1, 1]} : vector<16x256xf32> to vector<16x64xf32>
    %172 = math.tanh %171 : vector<16x64xf32>
    %173 = vector.extract_strided_slice %158 {offsets = [0, 192], sizes = [16, 64], strides = [1, 1]} : vector<16x256xf32> to vector<16x64xf32>
    %174 = arith.negf %173 : vector<16x64xf32>
    %175 = math.exp %174 : vector<16x64xf32>
    %cst_33 = arith.constant 1.000000e+00 : f32
    %176 = vector.broadcast %cst_33 : f32 to vector<16x64xf32>
    %177 = arith.addf %176, %175 : vector<16x64xf32>
    %178 = arith.divf %176, %177 : vector<16x64xf32>
    %179 = arith.mulf %170, %152 : vector<16x64xf32>
    %180 = arith.mulf %164, %172 : vector<16x64xf32>
    %181 = arith.addf %179, %180 : vector<16x64xf32>
    %182 = math.tanh %181 : vector<16x64xf32>
    %183 = arith.mulf %178, %182 : vector<16x64xf32>
    %184 = arith.truncf %183 : vector<16x64xf32> to vector<16x64xbf16>
    %cst_34 = arith.constant dense<0.000000e+00> : vector<16x256xf32>
    %185 = tpu.matmul %184, %7, %cst_34 {dimension_numbers = #tpu.dot_dimension_numbers<[1], [0], [0], [1], [0, 0, 1, 1], [], []>} : vector<16x64xbf16>, vector<64x256xbf16>, vector<16x256xf32> -> vector<16x256xf32>
    %186 = vector.extract_strided_slice %6 {offsets = [96, 0], sizes = [16, 256], strides = [1, 1]} : vector<128x256xf32> to vector<16x256xf32>
    %187 = arith.addf %185, %186 : vector<16x256xf32>
    %188 = vector.extract_strided_slice %187 {offsets = [0, 0], sizes = [16, 64], strides = [1, 1]} : vector<16x256xf32> to vector<16x64xf32>
    %189 = arith.negf %188 : vector<16x64xf32>
    %190 = math.exp %189 : vector<16x64xf32>
    %cst_35 = arith.constant 1.000000e+00 : f32
    %191 = vector.broadcast %cst_35 : f32 to vector<16x64xf32>
    %192 = arith.addf %191, %190 : vector<16x64xf32>
    %193 = arith.divf %191, %192 : vector<16x64xf32>
    %194 = vector.extract_strided_slice %187 {offsets = [0, 64], sizes = [16, 64], strides = [1, 1]} : vector<16x256xf32> to vector<16x64xf32>
    %195 = arith.negf %194 : vector<16x64xf32>
    %196 = math.exp %195 : vector<16x64xf32>
    %cst_36 = arith.constant 1.000000e+00 : f32
    %197 = vector.broadcast %cst_36 : f32 to vector<16x64xf32>
    %198 = arith.addf %197, %196 : vector<16x64xf32>
    %199 = arith.divf %197, %198 : vector<16x64xf32>
    %200 = vector.extract_strided_slice %187 {offsets = [0, 128], sizes = [16, 64], strides = [1, 1]} : vector<16x256xf32> to vector<16x64xf32>
    %201 = math.tanh %200 : vector<16x64xf32>
    %202 = vector.extract_strided_slice %187 {offsets = [0, 192], sizes = [16, 64], strides = [1, 1]} : vector<16x256xf32> to vector<16x64xf32>
    %203 = arith.negf %202 : vector<16x64xf32>
    %204 = math.exp %203 : vector<16x64xf32>
    %cst_37 = arith.constant 1.000000e+00 : f32
    %205 = vector.broadcast %cst_37 : f32 to vector<16x64xf32>
    %206 = arith.addf %205, %204 : vector<16x64xf32>
    %207 = arith.divf %205, %206 : vector<16x64xf32>
    %208 = arith.mulf %199, %181 : vector<16x64xf32>
    %209 = arith.mulf %193, %201 : vector<16x64xf32>
    %210 = arith.addf %208, %209 : vector<16x64xf32>
    %211 = math.tanh %210 : vector<16x64xf32>
    %212 = arith.mulf %207, %211 : vector<16x64xf32>
    %213 = arith.truncf %212 : vector<16x64xf32> to vector<16x64xbf16>
    %cst_38 = arith.constant dense<0.000000e+00> : vector<16x256xf32>
    %214 = tpu.matmul %213, %7, %cst_38 {dimension_numbers = #tpu.dot_dimension_numbers<[1], [0], [0], [1], [0, 0, 1, 1], [], []>} : vector<16x64xbf16>, vector<64x256xbf16>, vector<16x256xf32> -> vector<16x256xf32>
    %215 = vector.extract_strided_slice %6 {offsets = [112, 0], sizes = [16, 256], strides = [1, 1]} : vector<128x256xf32> to vector<16x256xf32>
    %216 = arith.addf %214, %215 : vector<16x256xf32>
    %217 = vector.extract_strided_slice %216 {offsets = [0, 0], sizes = [16, 64], strides = [1, 1]} : vector<16x256xf32> to vector<16x64xf32>
    %218 = arith.negf %217 : vector<16x64xf32>
    %219 = math.exp %218 : vector<16x64xf32>
    %cst_39 = arith.constant 1.000000e+00 : f32
    %220 = vector.broadcast %cst_39 : f32 to vector<16x64xf32>
    %221 = arith.addf %220, %219 : vector<16x64xf32>
    %222 = arith.divf %220, %221 : vector<16x64xf32>
    %223 = vector.extract_strided_slice %216 {offsets = [0, 64], sizes = [16, 64], strides = [1, 1]} : vector<16x256xf32> to vector<16x64xf32>
    %224 = arith.negf %223 : vector<16x64xf32>
    %225 = math.exp %224 : vector<16x64xf32>
    %cst_40 = arith.constant 1.000000e+00 : f32
    %226 = vector.broadcast %cst_40 : f32 to vector<16x64xf32>
    %227 = arith.addf %226, %225 : vector<16x64xf32>
    %228 = arith.divf %226, %227 : vector<16x64xf32>
    %229 = vector.extract_strided_slice %216 {offsets = [0, 128], sizes = [16, 64], strides = [1, 1]} : vector<16x256xf32> to vector<16x64xf32>
    %230 = math.tanh %229 : vector<16x64xf32>
    %231 = vector.extract_strided_slice %216 {offsets = [0, 192], sizes = [16, 64], strides = [1, 1]} : vector<16x256xf32> to vector<16x64xf32>
    %232 = arith.negf %231 : vector<16x64xf32>
    %233 = math.exp %232 : vector<16x64xf32>
    %cst_41 = arith.constant 1.000000e+00 : f32
    %234 = vector.broadcast %cst_41 : f32 to vector<16x64xf32>
    %235 = arith.addf %234, %233 : vector<16x64xf32>
    %236 = arith.divf %234, %235 : vector<16x64xf32>
    %237 = arith.mulf %228, %210 : vector<16x64xf32>
    %238 = arith.mulf %222, %230 : vector<16x64xf32>
    %239 = arith.addf %237, %238 : vector<16x64xf32>
    %240 = math.tanh %239 : vector<16x64xf32>
    %241 = arith.mulf %236, %240 : vector<16x64xf32>
    %242 = arith.truncf %241 : vector<16x64xf32> to vector<16x64xbf16>
    %c0_42 = arith.constant 0 : index
    %c0_43 = arith.constant 0 : index
    %243 = vector.load %arg5[%c0_42, %c0_43] : memref<64x4xbf16, #tpu.memory_space<vmem>>, vector<64x4xbf16>
    %cst_44 = arith.constant dense<0.000000e+00> : vector<16x4xf32>
    %244 = tpu.matmul %242, %243, %cst_44 {dimension_numbers = #tpu.dot_dimension_numbers<[1], [0], [0], [1], [0, 0, 1, 1], [], []>} : vector<16x64xbf16>, vector<64x4xbf16>, vector<16x4xf32> -> vector<16x4xf32>
    %c0_45 = arith.constant 0 : index
    %c0_46 = arith.constant 0 : index
    %245 = vector.load %arg6[%c0_45, %c0_46] : memref<1x4xf32, #tpu.memory_space<vmem>>, vector<1x4xf32>
    %246 = vector.broadcast %245 : vector<1x4xf32> to vector<16x4xf32>
    %247 = arith.addf %244, %246 : vector<16x4xf32>
    %c0_47 = arith.constant 0 : index
    %c0_48 = arith.constant 0 : index
    %248 = vector.load %arg7[%c0_47, %c0_48] : memref<16x4xf32, #tpu.memory_space<vmem>>, vector<16x4xf32>
    tpu.vector_store %arg7[%c0_47, %c0_48], %247 {strides = array<i32>} : memref<16x4xf32, #tpu.memory_space<vmem>>, vector<16x4xf32>,
    return
  }
  func.func @transform_0(%arg0: i32) -> (i32, i32, i32) {
    %c0_i32 = arith.constant 0 : i32
    %c0_i32_0 = arith.constant 0 : i32
    %c0_i32_1 = arith.constant 0 : i32
    return %c0_i32, %arg0, %c0_i32_0 : i32, i32, i32
  }
  func.func @transform_1(%arg0: i32) -> (i32, i32) {
    %c0_i32 = arith.constant 0 : i32
    %c0_i32_0 = arith.constant 0 : i32
    %c0_i32_1 = arith.constant 0 : i32
    return %c0_i32, %c0_i32_0 : i32, i32
  }
  func.func @transform_2(%arg0: i32) -> (i32, i32) {
    %c0_i32 = arith.constant 0 : i32
    %c0_i32_0 = arith.constant 0 : i32
    %c0_i32_1 = arith.constant 0 : i32
    return %c0_i32, %c0_i32_0 : i32, i32
  }
  func.func @transform_3(%arg0: i32) -> (i32, i32) {
    %c0_i32 = arith.constant 0 : i32
    %c0_i32_0 = arith.constant 0 : i32
    %c0_i32_1 = arith.constant 0 : i32
    return %c0_i32, %c0_i32_0 : i32, i32
  }
  func.func @transform_4(%arg0: i32) -> (i32, i32) {
    %c0_i32 = arith.constant 0 : i32
    %c0_i32_0 = arith.constant 0 : i32
    %c0_i32_1 = arith.constant 0 : i32
    return %c0_i32, %c0_i32_0 : i32, i32
  }
  func.func @transform_5(%arg0: i32) -> (i32, i32) {
    %c0_i32 = arith.constant 0 : i32
    %c0_i32_0 = arith.constant 0 : i32
    %c0_i32_1 = arith.constant 0 : i32
    return %c0_i32, %c0_i32_0 : i32, i32
  }
  func.func @transform_6(%arg0: i32) -> (i32, i32) {
    %c0_i32 = arith.constant 0 : i32
    %c0_i32_0 = arith.constant 0 : i32
    return %arg0, %c0_i32 : i32, i32
  }
}

</mosaic_0001>

<bundles_post_ra>
// kernel: bilstm_classifier_forward.1
= control target key start
LH: loop header
LB: loop body
LE: loop exit
PB: predicated region body
PF: predicated region fallthrough
CT: control target
= control target key end

     0   :  { %v1525_v1 = vmov 0   ;;  %vm116_vm0 = vcmask 261120   ;;  %v46_v40 = vlaneseq  ;;  %vm302_vm1 = vcmask 523264   ;;  %s1941_s1 = inlined_call_operand.vmem [shape: bf16[32,256], index: 1, kind: input, shape index: {}]   ;;  %s1942_s0 = inlined_call_operand.vmem [shape: bf16[8,16,32], index: 0, kind: input, shape index: {}]   ;;  %s1943_s2 = inlined_call_operand.vmem [shape: bf16[64,256], index: 2, kind: input, shape index: {}]   ;;  %s1944_s3 = inlined_call_operand.vmem [shape: f32[1,256], index: 3, kind: input, shape index: {}]   ;;  %s1945_s4 = inlined_call_operand.vmem [shape: bf16[64,4], index: 4, kind: input, shape index: {}]   ;;  %s1946_s5 = inlined_call_operand.vmem [shape: f32[1,4], index: 5, kind: input, shape index: {}]   ;;  %s1947_s6 = inlined_call_operand.vmem [shape: f32[16,4], index: 6, kind: output, shape index: {}]  }
   0x1   :  { %v1303_v0 = vld [vmem:[%s1941_s1 + $0x4] ss:$8 sps:$4 sm:$0xff]   ;;  %173 = vmatprep.mubr.bf16.mxu1 %v1525_v1  ;;  %526 = vmatprep.mubr.bf16.mxu0 %v1525_v1  ;;  %v1305_v2 = vld [vmem:[%s1941_s1] ss:$8 sps:$4 sm:$0xff]   ;;  %v1306_v3 = vld [vmem:[%s1941_s1 + $0x14] ss:$8 sps:$4 sm:$0xff]  }
   0x2   :  { %141 = vmatprep.subr.bf16.mxu1 %v1303_v0  ;;  %v1308_v4 = vld [vmem:[%s1941_s1 + $0x10] ss:$8 sps:$4 sm:$0xff]   ;;  %v1581_v5 = vld [vmem:[%s1943_s2 + $0x4] ss:$8 sps:$4 sm:$0xff]   ;;  %v1586_v6 = vld [vmem:[%s1943_s2] ss:$8 sps:$4 sm:$0xff]  }
   0x3   :  { %142 = vmatpush1.bf16.msra.mxu1 %v1305_v2  ;;  %v1309_v7 = vld [vmem:[%s1942_s0] sm:$0xff]   ;;  %494 = vmatprep.subr.bf16.mxu0 %v1581_v5  ;;  %v1595_v8 = vld [vmem:[%s1943_s2 + $0x14] ss:$8 sps:$4 sm:$0xff]   ;;  %v1604_v9 = vld [vmem:[%s1943_s2 + $0x10] ss:$8 sps:$4 sm:$0xff]   ;;  %v47_v42 = vshrl.u32 %v46_v40, 7 }
   0x4   :  { %143 = vmatprep.subr.bf16.mxu1 %v1306_v3  ;;  %495 = vmatpush1.bf16.msra.mxu0 %v1586_v6  ;;  %v1611_v10 = vld [vmem:[%s1943_s2 + $0x24] ss:$8 sps:$4 sm:$0xff]   ;;  %v1622_v12 = vld [vmem:[%s1943_s2 + $0x20] ss:$8 sps:$4 sm:$0xff]   ;;  %v1628_v13 = vld [vmem:[%s1943_s2 + $0x34] ss:$8 sps:$4 sm:$0xff]  }
   0x5   :  { %496 = vmatprep.subr.bf16.mxu0 %v1595_v8  ;;  %v1313_v11 = vld [vmem:[%s1942_s0 + $0x8] sm:$0xff]   ;;  %v1637_v14 = vld [vmem:[%s1943_s2 + $0x30] ss:$8 sps:$4 sm:$0xff]   ;;  %v1319_v17 = vld [vmem:[%s1942_s0 + $0x20] sm:$0xff]   ;;  %v48_v46 = vsub.s32 0, %v47_v42  ;;  %v52_v58 = vsub.s32 1, %v47_v42 }
   0x6   :  { %v1314_v15 = vld [vmem:[%s1942_s0 + $0x10] sm:$0xff]   ;;  %v1318_v16 = vld [vmem:[%s1942_s0 + $0x18] sm:$0xff]   ;;  %v1323_v18 = vld [vmem:[%s1942_s0 + $0x28] sm:$0xff]   ;;  %vm1528_vm2 = vmmov 0   ;;  %vm1138_vm3 = vcmask 31744  }
   0x7   :  { %144 = vmatpush1.bf16.msra.mxu1 %v1308_v4  ;;  %v1324_v19 = vld [vmem:[%s1942_s0 + $0x30] sm:$0xff]   ;;  %v1328_v20 = vld [vmem:[%s1942_s0 + $0x38] sm:$0xff]   ;;  %v44_v48 = vld [vmem:[%s1944_s3] sm:$0x3]  ;;  %s1526_s3 = smov 64  }
   0x8   :  { %306 = vmatprep.subr.bf16.mxu1 %v1581_v5  ;;  %497 = vmatpush1.bf16.msra.mxu0 %v1604_v9  ;;  %v1736_v49 = vrot.slane %v44_v48, %v48_v46  ;;  %v1740_v59 = vrot.slane %v44_v48, %v52_v58 }
   0x9   :  { %498 = vmatprep.subr.bf16.mxu0 %v1611_v10 }
   0xa   :  { %1157 = vmatmul.mubr.msk.bf16.vlgmr.msra.gmra.mrb[0].mxu1 %vm116_vm0, %v1309_v7 }
   0xb   :  { %307 = vmatpush1.bf16.msra.mxu1 %v1586_v6  ;;  %183 = vmatprep.mubr.bf16.mxu1 %v1525_v1 }
   0xc   :  { %308 = vmatprep.subr.bf16.mxu1 %v1595_v8  ;;  %499 = vmatpush1.bf16.msra.mxu0 %v1622_v12 }
   0xd   :  { %500 = vmatprep.subr.bf16.mxu0 %v1628_v13 }
   0xf   :  { %309 = vmatpush1.bf16.msra.mxu1 %v1604_v9 }
  0x10   :  { %310 = vmatprep.subr.bf16.mxu1 %v1611_v10  ;;  %501 = vmatpush1.bf16.msra.mxu0 %v1637_v14 }
  0x11   :  { %588 = vmatprep.subr.bf16.mxu0 %v1581_v5 }
  0x12   :  { %1158 = vmatmul.mubr.msk.bf16.gmra.mrb[4].mxu1 %vm116_vm0, %v1313_v11 }
  0x13   :  { %193 = vmatprep.mubr.bf16.mxu1 %v1525_v1  ;;  %311 = vmatpush1.bf16.msra.mxu1 %v1622_v12 }
  0x14   :  { %312 = vmatprep.subr.bf16.mxu1 %v1628_v13 }
  0x17   :  { %313 = vmatpush1.bf16.msra.mxu1 %v1637_v14 }
  0x18   :  { %400 = vmatprep.subr.bf16.mxu1 %v1581_v5 }
  0x1a   :  { %1159 = vmatmul.mubr.msk.bf16.gmra.mrb[8].mxu1 %vm116_vm0, %v1314_v15 }
  0x1b   :  { %203 = vmatprep.mubr.bf16.mxu1 %v1525_v1 }
  0x22   :  { %1160 = vmatmul.mubr.msk.bf16.gmra.mrb[12].mxu1 %vm116_vm0, %v1318_v16 }
  0x23   :  { %213 = vmatprep.mubr.bf16.mxu1 %v1525_v1 }
  0x2a   :  { %1161 = vmatmul.mubr.msk.bf16.gmra.mrb[16].mxu1 %vm116_vm0, %v1319_v17 }
  0x2b   :  { %223 = vmatprep.mubr.bf16.mxu1 %v1525_v1 }
  0x32   :  { %1162 = vmatmul.mubr.msk.bf16.gmra.mrb[20].mxu1 %vm116_vm0, %v1323_v18 }
  0x33   :  { %233 = vmatprep.mubr.bf16.mxu1 %v1525_v1 }
  0x3a   :  { %1163 = vmatmul.mubr.msk.bf16.gmra.mrb[24].mxu1 %vm116_vm0, %v1324_v19 }
  0x3b   :  { %243 = vmatprep.mubr.bf16.mxu1 %v1525_v1 }
  0x42   :  { %1164 = vmatmul.mubr.msk.bf16.gmra.mrb[28].mxu1 %vm116_vm0, %v1328_v20 }
  0x43   :  { %338 = vmatprep.mubr.bf16.mxu1 %v1525_v1 }
  0x4a   :  { %339 = vmatmul.mubr.bf16.vlgmr.msra.gmra.mrb[0].mxu1 %v1525_v1 }
  0x4b   :  { %401 = vmatpush1.bf16.msra.mxu1 %v1586_v6  ;;  %432 = vmatprep.mubr.bf16.mxu1 %v1525_v1 }
  0x4c   :  { %402 = vmatprep.subr.bf16.mxu1 %v1595_v8 }
  0x4f   :  { %403 = vmatpush1.bf16.msra.mxu1 %v1604_v9 }
  0x50   :  { %404 = vmatprep.subr.bf16.mxu1 %v1611_v10 }
  0x53   :  { %405 = vmatpush1.bf16.msra.mxu1 %v1622_v12 }
  0x54   :  { %406 = vmatprep.subr.bf16.mxu1 %v1628_v13 }
  0x57   :  { %407 = vmatpush1.bf16.msra.mxu1 %v1637_v14 }
  0xed   :  { %v1685_v21 = vpop.f32.mrb[8].mxu1 }
  0xee   :  { %v1687_v22 = vpop.f32.mrb[9].mxu1 }
  0xef   :  { %v1689_v23 = vpop.f32.mrb[10].mxu1 }
  0xf0   :  { %v1691_v24 = vpop.f32.mrb[11].mxu1 }
  0xf5   :  { %v1693_v25 = vpop.f32.mrb[12].mxu1 }
  0xf6   :  { %v1695_v26 = vpop.f32.mrb[13].mxu1 }
  0xf7   :  { %v1697_v27 = vpop.f32.mrb[14].mxu1 }
  0xf8   :  { %v1699_v28 = vpop.f32.mrb[15].mxu1 }
  0xfd   :  { %v1701_v29 = vpop.f32.mrb[16].mxu1 }
  0xfe   :  { %v1703_v30 = vpop.f32.mrb[17].mxu1 }
  0xff   :  { %v1705_v31 = vpop.f32.mrb[18].mxu1 }
 0x100   :  { %v1707_v32 = vpop.f32.mrb[19].mxu1 }
 0x105   :  { %v1709_v33 = vpop.f32.mrb[20].mxu1 }
 0x106   :  { %v1711_v34 = vpop.f32.mrb[21].mxu1 }
 0x107   :  { %v1713_v35 = vpop.f32.mrb[22].mxu1 }
 0x108   :  { %v1715_v36 = vpop.f32.mrb[23].mxu1 }
 0x10d   :  { %v1717_v37 = vpop.f32.mrb[24].mxu1 }
 0x10e   :  { %v1719_v38 = vpop.f32.mrb[25].mxu1 }
 0x10f   :  { %v1721_v39 = vpop.f32.mrb[26].mxu1 }
 0x110   :  { %v1723_v41 = vpop.f32.mrb[27].mxu1 }
 0x115   :  { %v1725_v43 = vpop.f32.mrb[28].mxu1 }
 0x116   :  { %v1727_v44 = vpop.f32.mrb[29].mxu1 }
 0x117   :  { %v1729_v45 = vpop.f32.mrb[30].mxu1 }
 0x118   :  { %v1731_v47 = vpop.f32.mrb[31].mxu1 }
 0x11d   :  { %v340_v50 = vpop.f32.mrb[0].mxu1 }
 0x11e   :  { %v1235_v51 = vadd.f32 %v340_v50, %v1736_v49  ;;  %v342_v52 = vpop.f32.mrb[1].mxu1 }
 0x11f   :  { %v344_v53 = vpop.f32.mrb[2].mxu1  ;;  %v1236_v60 = vadd.f32 %v342_v52, %v1740_v59 }
 0x120   :  { %v1173_v54 = vmul.f32 -1.442695, %v1235_v51  ;;  %v1237_v55 = vadd.f32 %v344_v53, %v1736_v49  ;;  %v346_v56 = vpop.f32.mrb[3].mxu1 }
 0x121   :  { %v1238_v62 = vadd.f32 %v346_v56, %v1740_v59  ;;  %v1175_v17 = vmul.f32 -1.442695, %v1236_v60 }
 0x122   :  { %1333 = vpow2.f32 %v1173_v54  ;;  %v1174_v57 = vmul.f32 -1.442695, %v1237_v55 }
 0x123   :  { %v1176_v18 = vmul.f32 -1.442695, %v1238_v62 }
 0x124   :  { %1335 = vpow2.f32 %v1174_v57 }
 0x125   :  { %1337 = vtanh.f32 %v1236_v60 }
 0x12c   :  { %v1334_v61 = vpop.eup %1333 }
 0x12d   :  { %v355_v63 = vadd.f32 1.0, %v1334_v61 }
 0x12e   :  { %v1336_v0 = vpop.eup %1335 }
 0x12f   :  { %1339 = vrcp.f32 %v355_v63  ;;  %v356_v2 = vadd.f32 1.0, %v1336_v0  ;;  %v1338_v3 = vpop.eup %1337 }
 0x130   :  { %1341 = vtanh.f32 %v1238_v62 }
 0x131   :  { %1343 = vrcp.f32 %v356_v2 }
 0x132   :  { %1345 = vpow2.f32 %v1175_v17 }
 0x133   :  { %1347 = vpow2.f32 %v1176_v18 }
 0x139   :  { %v1340_v4 = vpop.eup %1339 }
 0x13a   :  { %v1342_v7 = vpop.eup %1341  ;;  %v377_v11 = vmul.f32 %v1340_v4, %v1338_v3  ;;  %v375_v40 = vmul.f32 0.0, %v1340_v4 }
 0x13b   :  { %v1344_v15 = vpop.eup %1343 }
 0x13c   :  { %381 = vrot.lane.b32.xlu0 %v377_v11, %s1526_s3  ;;  %v378_v16 = vmul.f32 %v1344_v15, %v1342_v7  ;;  %v1346_v19 = vpop.eup %1345  ;;  %v376_v51 = vmul.f32 0.0, %v1344_v15 }
 0x13d   :  { %v1348_v20 = vpop.eup %1347  ;;  %v369_v42 = vadd.f32 1.0, %v1346_v19 }
 0x13e   :  { %v370_v50 = vadd.f32 1.0, %v1348_v20 }
 0x13f   :  { %1349 = vrcp.f32 %v369_v42 }
 0x140   :  { %383 = vrot.lane.b32.xlu0 %v378_v16, %s1526_s3 }
 0x149   :  { %v1350_v54 = vpop.eup %1349 }
 0x1ae   :  { %v382_v46 = vpop.permute.xlu0 %381 }
 0x1af   :  { %v387_v48 = vadd.f32 %v382_v46, %v375_v40 }
 0x1b1   :  { %1351 = vtanh.f32 %v387_v48 }
 0x1b2   :  { %v384_v52 = vpop.permute.xlu0 %383  ;;  %1353 = vrcp.f32 %v370_v50 }
 0x1b3   :  { %v388_v53 = vadd.f32 %v384_v52, %v376_v51 }
 0x1b5   :  { %1355 = vtanh.f32 %v388_v53 }
 0x1bb   :  { %v1352_v55 = vpop.eup %1351 }
 0x1bc   :  { %v1354_v56 = vpop.eup %1353  ;;  %v391_v58 = vmul.f32 %v1352_v55, %v1350_v54 }
 0x1bf   :  { %v1356_v57 = vpop.eup %1355 }
 0x1c0   :  { %v392_v60 = vmul.f32 %v1356_v57, %v1354_v56 }
 0x1c2   :  { %v393_v61 = vpack.c.bf16 %v392_v60, %v391_v58 }
 0x1c4   :  { %395 = vrot.lane.b32.xlu1 %v393_v61, %s1526_s3 }
 0x236   :  { %v396_v62 = vpop.permute.xlu1 %395 }
 0x237   :  { %1177 = vmatmul.mubr.msk.bf16.vlgmr.msra.gmra.mrb[4].mxu1 %vm302_vm1, %v396_v62 }
 0x30a   :  { %v434_v63 = vpop.f32.mrb[4].mxu1 }
 0x30b   :  { %v1239_v0 = vadd.f32 %v434_v63, %v1736_v49  ;;  %v436_v2 = vpop.f32.mrb[5].mxu1 }
 0x30c   :  { %v438_v3 = vpop.f32.mrb[6].mxu1  ;;  %v1240_v16 = vadd.f32 %v436_v2, %v1740_v59 }
 0x30d   :  { %v1178_v4 = vmul.f32 -1.442695, %v1239_v0  ;;  %v1241_v7 = vadd.f32 %v438_v3, %v1736_v49  ;;  %v440_v11 = vpop.f32.mrb[7].mxu1 }
 0x30e   :  { %v1242_v18 = vadd.f32 %v440_v11, %v1740_v59  ;;  %v1180_v55 = vmul.f32 -1.442695, %v1240_v16 }
 0x30f   :  { %1357 = vpow2.f32 %v1178_v4  ;;  %v1179_v15 = vmul.f32 -1.442695, %v1241_v7 }
 0x310   :  { %v1181_v56 = vmul.f32 -1.442695, %v1242_v18 }
 0x311   :  { %1359 = vpow2.f32 %v1179_v15 }
 0x312   :  { %1361 = vtanh.f32 %v1240_v16 }
 0x319   :  { %v1358_v17 = vpop.eup %1357 }
 0x31a   :  { %v449_v19 = vadd.f32 1.0, %v1358_v17 }
 0x31b   :  { %v1360_v20 = vpop.eup %1359 }
 0x31c   :  { %1363 = vrcp.f32 %v449_v19  ;;  %v450_v40 = vadd.f32 1.0, %v1360_v20  ;;  %v1362_v42 = vpop.eup %1361  ;;  %v198_v20 = vadd.f32 %v1687_v22, %v1740_v59 }
 0x31d   :  { %1365 = vtanh.f32 %v1242_v18 }
 0x31e   :  { %1367 = vrcp.f32 %v450_v40 }
 0x31f   :  { %1369 = vpow2.f32 %v1180_v55 }
 0x320   :  { %1371 = vpow2.f32 %v1181_v56 }
 0x326   :  { %v1364_v46 = vpop.eup %1363 }
 0x327   :  { %v1366_v50 = vpop.eup %1365  ;;  %v471_v51 = vmul.f32 %v1364_v46, %v1362_v42  ;;  %v469_v61 = vmul.f32 %v1364_v46, %v387_v48  ;;  %v200_v42 = vadd.f32 %v1689_v23, %v1736_v49 }
 0x328   :  { %v1368_v52 = vpop.eup %1367 }
 0x329   :  { %475 = vrot.lane.b32.xlu1 %v471_v51, %s1526_s3  ;;  %v472_v54 = vmul.f32 %v1368_v52, %v1366_v50  ;;  %v1370_v57 = vpop.eup %1369  ;;  %v470_v2 = vmul.f32 %v1368_v52, %v388_v53  ;;  %v196_v53 = vadd.f32 %v1685_v21, %v1736_v49  ;;  %v202_v51 = vadd.f32 %v1691_v24, %v1740_v59 }
 0x32a   :  { %v1372_v58 = vpop.eup %1371  ;;  %v463_v60 = vadd.f32 1.0, %v1370_v57 }
 0x32b   :  { %477 = vrot.lane.b32.xlu0 %v472_v54, %s1526_s3  ;;  %v464_v62 = vadd.f32 1.0, %v1372_v58 }
 0x32c   :  { %1373 = vrcp.f32 %v463_v60 }
 0x336   :  { %v1374_v7 = vpop.eup %1373 }
 0x39b   :  { %v476_v63 = vpop.permute.xlu1 %475 }
 0x39c   :  { %v1754_v0 = vadd.f32 %v476_v63, %v469_v61 }
 0x39d   :  { %v478_v3 = vpop.permute.xlu0 %477 }
 0x39e   :  { %1375 = vtanh.f32 %v1754_v0  ;;  %v1757_v4 = vadd.f32 %v478_v3, %v470_v2 }
 0x39f   :  { %1377 = vrcp.f32 %v464_v62 }
 0x3a0   :  { %1379 = vtanh.f32 %v1757_v4 }
 0x3a8   :  { %v1376_v11 = vpop.eup %1375 }
 0x3a9   :  { %v1378_v15 = vpop.eup %1377  ;;  %v485_v17 = vmul.f32 %v1376_v11, %v1374_v7 }
 0x3aa   :  { %v1380_v16 = vpop.eup %1379 }
 0x3ab   :  { %v486_v48 = vmul.f32 %v1380_v16, %v1378_v15 }
 0x3ad   :  { %v487_v18 = vpack.c.bf16 %v486_v48, %v485_v17 }
 0x3af   :  { %489 = vrot.lane.b32.xlu1 %v487_v18, %s1526_s3 }
 0x421   :  { %v490_v19 = vpop.permute.xlu1 %489 }
 0x422   :  { %1182 = vmatmul.mubr.msk.bf16.vlgmr.msra.gmra.mrb[0].mxu0 %vm302_vm1, %v490_v19 }
 0x423   :  { %589 = vmatpush1.bf16.msra.mxu0 %v1586_v6  ;;  %620 = vmatprep.mubr.bf16.mxu0 %v1525_v1 }
 0x424   :  { %590 = vmatprep.subr.bf16.mxu0 %v1595_v8 }
 0x427   :  { %591 = vmatpush1.bf16.msra.mxu0 %v1604_v9 }
 0x428   :  { %592 = vmatprep.subr.bf16.mxu0 %v1611_v10 }
 0x42b   :  { %593 = vmatpush1.bf16.msra.mxu0 %v1622_v12 }
 0x42c   :  { %594 = vmatprep.subr.bf16.mxu0 %v1628_v13 }
 0x42f   :  { %595 = vmatpush1.bf16.msra.mxu0 %v1637_v14 }
 0x430   :  { %682 = vmatprep.subr.bf16.mxu0 %v1581_v5 }
 0x4f5   :  { %v528_v40 = vpop.f32.mrb[0].mxu0 }
 0x4f6   :  { %v529_v46 = vadd.f32 %v528_v40, %v196_v53  ;;  %v530_v50 = vpop.f32.mrb[1].mxu0 }
 0x4f7   :  { %v531_v52 = vadd.f32 %v530_v50, %v198_v20  ;;  %v532_v54 = vpop.f32.mrb[2].mxu0 }
 0x4f8   :  { %v1183_v55 = vmul.f32 -1.442695, %v529_v46  ;;  %v533_v56 = vadd.f32 %v532_v54, %v200_v42  ;;  %v534_v57 = vpop.f32.mrb[3].mxu0 }
 0x4f9   :  { %v535_v58 = vadd.f32 %v534_v57, %v202_v51  ;;  %v1185_v11 = vmul.f32 -1.442695, %v531_v52 }
 0x4fa   :  { %1381 = vpow2.f32 %v1183_v55  ;;  %v1184_v21 = vmul.f32 -1.442695, %v533_v56 }
 0x4fb   :  { %v1186_v15 = vmul.f32 -1.442695, %v535_v58 }
 0x4fc   :  { %1383 = vpow2.f32 %v1184_v21 }
 0x4fd   :  { %1385 = vtanh.f32 %v531_v52 }
 0x504   :  { %v1382_v60 = vpop.eup %1381 }
 0x505   :  { %v543_v22 = vadd.f32 1.0, %v1382_v60  ;;  %v210_v60 = vadd.f32 %v1697_v27, %v1736_v49 }
 0x506   :  { %v1384_v61 = vpop.eup %1383 }
 0x507   :  { %1387 = vrcp.f32 %v543_v22  ;;  %v544_v23 = vadd.f32 1.0, %v1384_v61  ;;  %v1386_v62 = vpop.eup %1385 }
 0x508   :  { %1389 = vtanh.f32 %v535_v58  ;;  %v208_v58 = vadd.f32 %v1695_v26, %v1740_v59 }
 0x509   :  { %1391 = vrcp.f32 %v544_v23  ;;  %v212_v23 = vadd.f32 %v1699_v28, %v1740_v59 }
 0x50a   :  { %1393 = vpow2.f32 %v1185_v11 }
 0x50b   :  { %1395 = vpow2.f32 %v1186_v15 }
 0x511   :  { %v1388_v63 = vpop.eup %1387 }
 0x512   :  { %v1390_v24 = vpop.eup %1389  ;;  %v565_v2 = vmul.f32 %v1388_v63, %v1386_v62  ;;  %v563_v18 = vmul.f32 %v1388_v63, %v1754_v0 }
 0x513   :  { %v1392_v3 = vpop.eup %1391 }
 0x514   :  { %569 = vrot.lane.b32.xlu0 %v565_v2, %s1526_s3  ;;  %v566_v7 = vmul.f32 %v1392_v3, %v1390_v24  ;;  %v1394_v16 = vpop.eup %1393  ;;  %v564_v40 = vmul.f32 %v1392_v3, %v1757_v4  ;;  %v206_v4 = vadd.f32 %v1693_v25, %v1736_v49 }
 0x515   :  { %v1396_v17 = vpop.eup %1395  ;;  %v557_v48 = vadd.f32 1.0, %v1394_v16 }
 0x516   :  { %571 = vrot.lane.b32.xlu1 %v566_v7, %s1526_s3  ;;  %v558_v19 = vadd.f32 1.0, %v1396_v17 }
 0x517   :  { %1397 = vrcp.f32 %v557_v48 }
 0x521   :  { %v1398_v50 = vpop.eup %1397 }
 0x586   :  { %v570_v53 = vpop.permute.xlu0 %569 }
 0x587   :  { %v1782_v20 = vadd.f32 %v570_v53, %v563_v18 }
 0x588   :  { %v572_v42 = vpop.permute.xlu1 %571 }
 0x589   :  { %1399 = vtanh.f32 %v1782_v20  ;;  %v1786_v46 = vadd.f32 %v572_v42, %v564_v40 }
 0x58a   :  { %1401 = vrcp.f32 %v558_v19 }
 0x58b   :  { %1403 = vtanh.f32 %v1786_v46 }
 0x593   :  { %v1400_v51 = vpop.eup %1399 }
 0x594   :  { %v1402_v52 = vpop.eup %1401  ;;  %v579_v0 = vmul.f32 %v1400_v51, %v1398_v50 }
 0x595   :  { %v1404_v54 = vpop.eup %1403 }
 0x596   :  { %v580_v55 = vmul.f32 %v1404_v54, %v1402_v52 }
 0x598   :  { %v581_v56 = vpack.c.bf16 %v580_v55, %v579_v0 }
 0x59a   :  { %583 = vrot.lane.b32.xlu0 %v581_v56, %s1526_s3 }
 0x60c   :  { %v584_v57 = vpop.permute.xlu0 %583 }
 0x60d   :  { %1187 = vmatmul.mubr.msk.bf16.vlgmr.msra.gmra.mrb[4].mxu0 %vm302_vm1, %v584_v57 }
 0x60e   :  { %683 = vmatpush1.bf16.msra.mxu0 %v1586_v6  ;;  %714 = vmatprep.mubr.bf16.mxu0 %v1525_v1 }
 0x60f   :  { %684 = vmatprep.subr.bf16.mxu0 %v1595_v8 }
 0x612   :  { %685 = vmatpush1.bf16.msra.mxu0 %v1604_v9 }
 0x613   :  { %686 = vmatprep.subr.bf16.mxu0 %v1611_v10 }
 0x616   :  { %687 = vmatpush1.bf16.msra.mxu0 %v1622_v12 }
 0x617   :  { %688 = vmatprep.subr.bf16.mxu0 %v1628_v13 }
 0x61a   :  { %689 = vmatpush1.bf16.msra.mxu0 %v1637_v14 }
 0x61b   :  { %776 = vmatprep.subr.bf16.mxu0 %v1581_v5 }
 0x6e0   :  { %v622_v21 = vpop.f32.mrb[4].mxu0 }
 0x6e1   :  { %v623_v22 = vadd.f32 %v622_v21, %v206_v4  ;;  %v624_v61 = vpop.f32.mrb[5].mxu0 }
 0x6e2   :  { %v625_v62 = vadd.f32 %v624_v61, %v208_v58  ;;  %v626_v63 = vpop.f32.mrb[6].mxu0 }
 0x6e3   :  { %v1188_v24 = vmul.f32 -1.442695, %v623_v22  ;;  %v627_v2 = vadd.f32 %v626_v63, %v210_v60  ;;  %v628_v3 = vpop.f32.mrb[7].mxu0  ;;  %v218_v63 = vadd.f32 %v1703_v30, %v1740_v59 }
 0x6e4   :  { %v629_v7 = vadd.f32 %v628_v3, %v212_v23  ;;  %v1190_v53 = vmul.f32 -1.442695, %v625_v62 }
 0x6e5   :  { %1405 = vpow2.f32 %v1188_v24  ;;  %v1189_v25 = vmul.f32 -1.442695, %v627_v2  ;;  %v220_v2 = vadd.f32 %v1705_v31, %v1736_v49 }
 0x6e6   :  { %v1191_v40 = vmul.f32 -1.442695, %v629_v7 }
 0x6e7   :  { %1407 = vpow2.f32 %v1189_v25  ;;  %v222_v25 = vadd.f32 %v1707_v32, %v1740_v59 }
 0x6e8   :  { %1409 = vtanh.f32 %v625_v62 }
 0x6ef   :  { %v1406_v11 = vpop.eup %1405 }
 0x6f0   :  { %v637_v26 = vadd.f32 1.0, %v1406_v11 }
 0x6f1   :  { %v1408_v15 = vpop.eup %1407 }
 0x6f2   :  { %1411 = vrcp.f32 %v637_v26  ;;  %v638_v27 = vadd.f32 1.0, %v1408_v15  ;;  %v1410_v16 = vpop.eup %1409 }
 0x6f3   :  { %1413 = vtanh.f32 %v629_v7 }
 0x6f4   :  { %1415 = vrcp.f32 %v638_v27 }
 0x6f5   :  { %1417 = vpow2.f32 %v1190_v53 }
 0x6f6   :  { %1419 = vpow2.f32 %v1191_v40 }
 0x6fc   :  { %v1412_v17 = vpop.eup %1411 }
 0x6fd   :  { %v1414_v28 = vpop.eup %1413  ;;  %v659_v48 = vmul.f32 %v1412_v17, %v1410_v16  ;;  %v657_v52 = vmul.f32 %v1412_v17, %v1782_v20 }
 0x6fe   :  { %v1416_v18 = vpop.eup %1415 }
 0x6ff   :  { %663 = vrot.lane.b32.xlu1 %v659_v48, %s1526_s3  ;;  %v660_v19 = vmul.f32 %v1416_v18, %v1414_v28  ;;  %v1418_v42 = vpop.eup %1417  ;;  %v658_v56 = vmul.f32 %v1416_v18, %v1786_v46  ;;  %v216_v46 = vadd.f32 %v1701_v29, %v1736_v49 }
 0x700   :  { %v1420_v50 = vpop.eup %1419  ;;  %v651_v51 = vadd.f32 1.0, %v1418_v42 }
 0x701   :  { %665 = vrot.lane.b32.xlu0 %v660_v19, %s1526_s3  ;;  %v652_v54 = vadd.f32 1.0, %v1420_v50 }
 0x702   :  { %1421 = vrcp.f32 %v651_v51 }
 0x70c   :  { %v1422_v58 = vpop.eup %1421 }
 0x771   :  { %v664_v0 = vpop.permute.xlu1 %663 }
 0x772   :  { %v1811_v55 = vadd.f32 %v664_v0, %v657_v52 }
 0x773   :  { %v666_v57 = vpop.permute.xlu0 %665 }
 0x774   :  { %1423 = vtanh.f32 %v1811_v55  ;;  %v1815_v4 = vadd.f32 %v666_v57, %v658_v56 }
 0x775   :  { %1425 = vrcp.f32 %v652_v54 }
 0x776   :  { %1427 = vtanh.f32 %v1815_v4 }
 0x77e   :  { %v1424_v21 = vpop.eup %1423 }
 0x77f   :  { %v1426_v60 = vpop.eup %1425  ;;  %v673_v20 = vmul.f32 %v1424_v21, %v1422_v58 }
 0x780   :  { %v1428_v22 = vpop.eup %1427 }
 0x781   :  { %v674_v61 = vmul.f32 %v1428_v22, %v1426_v60 }
 0x783   :  { %v675_v23 = vpack.c.bf16 %v674_v61, %v673_v20 }
 0x785   :  { %677 = vrot.lane.b32.xlu1 %v675_v23, %s1526_s3 }
 0x7f7   :  { %v678_v62 = vpop.permute.xlu1 %677 }
 0x7f8   :  { %1192 = vmatmul.mubr.msk.bf16.vlgmr.msra.gmra.mrb[8].mxu0 %vm302_vm1, %v678_v62 }
 0x7f9   :  { %777 = vmatpush1.bf16.msra.mxu0 %v1586_v6  ;;  %808 = vmatprep.mubr.bf16.mxu0 %v1525_v1 }
 0x7fa   :  { %778 = vmatprep.subr.bf16.mxu0 %v1595_v8 }
 0x7fd   :  { %779 = vmatpush1.bf16.msra.mxu0 %v1604_v9 }
 0x7fe   :  { %780 = vmatprep.subr.bf16.mxu0 %v1611_v10 }
 0x801   :  { %781 = vmatpush1.bf16.msra.mxu0 %v1622_v12 }
 0x802   :  { %782 = vmatprep.subr.bf16.mxu0 %v1628_v13 }
 0x805   :  { %783 = vmatpush1.bf16.msra.mxu0 %v1637_v14 }
 0x806   :  { %870 = vmatprep.subr.bf16.mxu0 %v1581_v5 }
 0x8cb   :  { %v716_v24 = vpop.f32.mrb[8].mxu0 }
 0x8cc   :  { %v717_v3 = vadd.f32 %v716_v24, %v216_v46  ;;  %v718_v7 = vpop.f32.mrb[9].mxu0 }
 0x8cd   :  { %v719_v11 = vadd.f32 %v718_v7, %v218_v63  ;;  %v720_v26 = vpop.f32.mrb[10].mxu0 }
 0x8ce   :  { %v1193_v15 = vmul.f32 -1.442695, %v717_v3  ;;  %v721_v27 = vadd.f32 %v720_v26, %v220_v2  ;;  %v722_v16 = vpop.f32.mrb[11].mxu0  ;;  %v228_v3 = vadd.f32 %v1711_v34, %v1740_v59 }
 0x8cf   :  { %v723_v17 = vadd.f32 %v722_v16, %v222_v25  ;;  %v1195_v50 = vmul.f32 -1.442695, %v719_v11  ;;  %v230_v25 = vadd.f32 %v1713_v35, %v1736_v49 }
 0x8d0   :  { %1429 = vpow2.f32 %v1193_v15  ;;  %v1194_v29 = vmul.f32 -1.442695, %v721_v27  ;;  %v232_v15 = vadd.f32 %v1715_v36, %v1740_v59 }
 0x8d1   :  { %v1196_v51 = vmul.f32 -1.442695, %v723_v17 }
 0x8d2   :  { %1431 = vpow2.f32 %v1194_v29 }
 0x8d3   :  { %1433 = vtanh.f32 %v719_v11 }
 0x8da   :  { %v1430_v28 = vpop.eup %1429 }
 0x8db   :  { %v731_v30 = vadd.f32 1.0, %v1430_v28 }
 0x8dc   :  { %v1432_v48 = vpop.eup %1431 }
 0x8dd   :  { %1435 = vrcp.f32 %v731_v30  ;;  %v732_v31 = vadd.f32 1.0, %v1432_v48  ;;  %v1434_v18 = vpop.eup %1433 }
 0x8de   :  { %1437 = vtanh.f32 %v723_v17 }
 0x8df   :  { %1439 = vrcp.f32 %v732_v31 }
 0x8e0   :  { %1441 = vpow2.f32 %v1195_v50 }
 0x8e1   :  { %1443 = vpow2.f32 %v1196_v51 }
 0x8e7   :  { %v1436_v19 = vpop.eup %1435 }
 0x8e8   :  { %v1438_v32 = vpop.eup %1437  ;;  %v753_v53 = vmul.f32 %v1436_v19, %v1434_v18  ;;  %v751_v56 = vmul.f32 %v1436_v19, %v1811_v55 }
 0x8e9   :  { %v1440_v40 = vpop.eup %1439 }
 0x8ea   :  { %757 = vrot.lane.b32.xlu0 %v753_v53, %s1526_s3  ;;  %v754_v42 = vmul.f32 %v1440_v40, %v1438_v32  ;;  %v1442_v52 = vpop.eup %1441  ;;  %v752_v60 = vmul.f32 %v1440_v40, %v1815_v4  ;;  %v226_v4 = vadd.f32 %v1709_v33, %v1736_v49 }
 0x8eb   :  { %v1444_v54 = vpop.eup %1443  ;;  %v745_v0 = vadd.f32 1.0, %v1442_v52 }
 0x8ec   :  { %759 = vrot.lane.b32.xlu1 %v754_v42, %s1526_s3  ;;  %v746_v57 = vadd.f32 1.0, %v1444_v54 }
 0x8ed   :  { %1445 = vrcp.f32 %v745_v0 }
 0x8f7   :  { %v1446_v61 = vpop.eup %1445 }
 0x95c   :  { %v758_v58 = vpop.permute.xlu0 %757 }
 0x95d   :  { %v1840_v21 = vadd.f32 %v758_v58, %v751_v56 }
 0x95e   :  { %v760_v22 = vpop.permute.xlu1 %759 }
 0x95f   :  { %1447 = vtanh.f32 %v1840_v21  ;;  %v1844_v20 = vadd.f32 %v760_v22, %v752_v60 }
 0x960   :  { %1449 = vrcp.f32 %v746_v57 }
 0x961   :  { %1451 = vtanh.f32 %v1844_v20 }
 0x969   :  { %v1448_v23 = vpop.eup %1447 }
 0x96a   :  { %v1450_v62 = vpop.eup %1449  ;;  %v767_v55 = vmul.f32 %v1448_v23, %v1446_v61 }
 0x96b   :  { %v1452_v46 = vpop.eup %1451 }
 0x96c   :  { %v768_v63 = vmul.f32 %v1452_v46, %v1450_v62 }
 0x96e   :  { %v769_v24 = vpack.c.bf16 %v768_v63, %v767_v55 }
 0x970   :  { %771 = vrot.lane.b32.xlu0 %v769_v24, %s1526_s3 }
 0x9e2   :  { %v772_v2 = vpop.permute.xlu0 %771 }
 0x9e3   :  { %1197 = vmatmul.mubr.msk.bf16.vlgmr.msra.gmra.mrb[12].mxu0 %vm302_vm1, %v772_v2 }
 0x9e4   :  { %871 = vmatpush1.bf16.msra.mxu0 %v1586_v6  ;;  %902 = vmatprep.mubr.bf16.mxu0 %v1525_v1 }
 0x9e5   :  { %872 = vmatprep.subr.bf16.mxu0 %v1595_v8 }
 0x9e8   :  { %873 = vmatpush1.bf16.msra.mxu0 %v1604_v9 }
 0x9e9   :  { %874 = vmatprep.subr.bf16.mxu0 %v1611_v10 }
 0x9ec   :  { %875 = vmatpush1.bf16.msra.mxu0 %v1622_v12 }
 0x9ed   :  { %876 = vmatprep.subr.bf16.mxu0 %v1628_v13 }
 0x9f0   :  { %877 = vmatpush1.bf16.msra.mxu0 %v1637_v14 }
 0x9f1   :  { %964 = vmatprep.subr.bf16.mxu0 %v1581_v5 }
 0xab6   :  { %v810_v7 = vpop.f32.mrb[12].mxu0 }
 0xab7   :  { %v811_v11 = vadd.f32 %v810_v7, %v226_v4  ;;  %v812_v26 = vpop.f32.mrb[13].mxu0 }
 0xab8   :  { %v813_v27 = vadd.f32 %v812_v26, %v228_v3  ;;  %v814_v16 = vpop.f32.mrb[14].mxu0 }
 0xab9   :  { %v1198_v17 = vmul.f32 -1.442695, %v811_v11  ;;  %v815_v29 = vadd.f32 %v814_v16, %v230_v25  ;;  %v816_v5 = vpop.f32.mrb[15].mxu0 }
 0xaba   :  { %v817_v28 = vadd.f32 %v816_v5, %v232_v15  ;;  %v1200_v40 = vmul.f32 -1.442695, %v813_v27 }
 0xabb   :  { %1453 = vpow2.f32 %v1198_v17  ;;  %v1199_v33 = vmul.f32 -1.442695, %v815_v29 }
 0xabc   :  { %v1201_v42 = vmul.f32 -1.442695, %v817_v28 }
 0xabd   :  { %1455 = vpow2.f32 %v1199_v33 }
 0xabe   :  { %1457 = vtanh.f32 %v813_v27 }
 0xac5   :  { %v1454_v30 = vpop.eup %1453 }
 0xac6   :  { %v825_v34 = vadd.f32 1.0, %v1454_v30 }
 0xac7   :  { %v1456_v48 = vpop.eup %1455 }
 0xac8   :  { %1459 = vrcp.f32 %v825_v34  ;;  %v826_v35 = vadd.f32 1.0, %v1456_v48  ;;  %v1458_v31 = vpop.eup %1457 }
 0xac9   :  { %1461 = vtanh.f32 %v817_v28 }
 0xaca   :  { %1463 = vrcp.f32 %v826_v35 }
 0xacb   :  { %1465 = vpow2.f32 %v1200_v40 }
 0xacc   :  { %1467 = vpow2.f32 %v1201_v42 }
 0xad2   :  { %v1460_v18 = vpop.eup %1459 }
 0xad3   :  { %v1462_v36 = vpop.eup %1461  ;;  %v847_v19 = vmul.f32 %v1460_v18, %v1458_v31  ;;  %v845_v54 = vmul.f32 %v1460_v18, %v1840_v21 }
 0xad4   :  { %v1464_v32 = vpop.eup %1463 }
 0xad5   :  { %851 = vrot.lane.b32.xlu1 %v847_v19, %s1526_s3  ;;  %v848_v53 = vmul.f32 %v1464_v32, %v1462_v36  ;;  %v1466_v50 = vpop.eup %1465  ;;  %v846_v58 = vmul.f32 %v1464_v32, %v1844_v20  ;;  %v236_v20 = vadd.f32 %v1717_v37, %v1736_v49 }
 0xad6   :  { %v1468_v51 = vpop.eup %1467  ;;  %v839_v52 = vadd.f32 1.0, %v1466_v50 }
 0xad7   :  { %853 = vrot.lane.b32.xlu0 %v848_v53, %s1526_s3  ;;  %v840_v0 = vadd.f32 1.0, %v1468_v51 }
 0xad8   :  { %1469 = vrcp.f32 %v839_v52 }
 0xae2   :  { %v1470_v61 = vpop.eup %1469 }
 0xb47   :  { %v852_v56 = vpop.permute.xlu1 %851 }
 0xb48   :  { %v1869_v57 = vadd.f32 %v852_v56, %v845_v54  ;;  %v248_v56 = vadd.f32 %v1727_v44, %v1740_v59 }
 0xb49   :  { %v854_v60 = vpop.permute.xlu0 %853 }
 0xb4a   :  { %1471 = vtanh.f32 %v1869_v57  ;;  %v1873_v22 = vadd.f32 %v854_v60, %v846_v58  ;;  %v250_v58 = vadd.f32 %v1729_v45, %v1736_v49 }
 0xb4b   :  { %1473 = vrcp.f32 %v840_v0  ;;  %v246_v0 = vadd.f32 %v1725_v43, %v1736_v49 }
 0xb4c   :  { %1475 = vtanh.f32 %v1873_v22 }
 0xb54   :  { %v1472_v23 = vpop.eup %1471 }
 0xb55   :  { %v1474_v62 = vpop.eup %1473  ;;  %v861_v21 = vmul.f32 %v1472_v23, %v1470_v61  ;;  %v252_v61 = vadd.f32 %v1731_v47, %v1740_v59 }
 0xb56   :  { %v1476_v46 = vpop.eup %1475 }
 0xb57   :  { %v862_v55 = vmul.f32 %v1476_v46, %v1474_v62 }
 0xb59   :  { %v863_v63 = vpack.c.bf16 %v862_v55, %v861_v21 }
 0xb5b   :  { %865 = vrot.lane.b32.xlu1 %v863_v63, %s1526_s3 }
 0xbcd   :  { %v866_v24 = vpop.permute.xlu1 %865 }
 0xbce   :  { %1202 = vmatmul.mubr.msk.bf16.vlgmr.msra.gmra.mrb[16].mxu0 %vm302_vm1, %v866_v24 }
 0xbcf   :  { %965 = vmatpush1.bf16.msra.mxu0 %v1586_v6  ;;  %996 = vmatprep.mubr.bf16.mxu0 %v1525_v1  ;;  %v238_v6 = vadd.f32 %v1719_v38, %v1740_v59  ;;  %v240_v1 = vadd.f32 %v1721_v39, %v1736_v49 }
 0xbd0   :  { %966 = vmatprep.subr.bf16.mxu0 %v1595_v8 }
 0xbd3   :  { %967 = vmatpush1.bf16.msra.mxu0 %v1604_v9 }
 0xbd4   :  { %968 = vmatprep.subr.bf16.mxu0 %v1611_v10  ;;  %v242_v10 = vadd.f32 %v1723_v41, %v1740_v59 }
 0xbd7   :  { %969 = vmatpush1.bf16.msra.mxu0 %v1622_v12 }
 0xbd8   :  { %970 = vmatprep.subr.bf16.mxu0 %v1628_v13 }
 0xbdb   :  { %971 = vmatpush1.bf16.msra.mxu0 %v1637_v14 }
 0xca1   :  { %v904_v2 = vpop.f32.mrb[16].mxu0 }
 0xca2   :  { %v905_v8 = vadd.f32 %v904_v2, %v236_v20  ;;  %v906_v9 = vpop.f32.mrb[17].mxu0 }
 0xca3   :  { %v907_v12 = vadd.f32 %v906_v9, %v238_v6  ;;  %v908_v4 = vpop.f32.mrb[18].mxu0  ;;  %v1329_v9 = vld [vmem:[%s1945_s4] sm:$0xff]  }
 0xca4   :  { %v1203_v13 = vmul.f32 -1.442695, %v905_v8  ;;  %v909_v3 = vadd.f32 %v908_v4, %v240_v1  ;;  %v910_v14 = vpop.f32.mrb[19].mxu0  ;;  %v1527_v8 = vmov 0.0   ;;  %v1332_v4 = vld [vmem:[%s1945_s4 + $0x18] sm:$0xff]  }
 0xca5   :  { %v911_v7 = vadd.f32 %v910_v14, %v242_v10  ;;  %v1205_v29 = vmul.f32 -1.442695, %v907_v12  ;;  %1223 = vmatprep.subr.bf16.mxu1 %v1527_v8  ;;  %1231 = vmatprep.mubr.msk.bf16.mxu1 %vm1528_vm2, %v1527_v8  ;;  %v1330_v10 = vld [vmem:[%s1945_s4 + $0x8] sm:$0xff]  }
 0xca6   :  { %1477 = vpow2.f32 %v1203_v13  ;;  %v1204_v37 = vmul.f32 -1.442695, %v909_v3  ;;  %1224 = vmatpush3.bf16.msra.mxu1 %v1329_v9 }
 0xca7   :  { %v1206_v5 = vmul.f32 -1.442695, %v911_v7  ;;  %1225 = vmatprep.subr.bf16.mxu1 %v1527_v8 }
 0xca8   :  { %1479 = vpow2.f32 %v1204_v37 }
 0xca9   :  { %1481 = vtanh.f32 %v907_v12  ;;  %v1331_v12 = vld [vmem:[%s1945_s4 + $0x10] sm:$0xff]  }
 0xcaa   :  { %1226 = vmatpush3.bf16.msra.mxu1 %v1330_v10 }
 0xcab   :  { %1227 = vmatprep.subr.bf16.mxu1 %v1527_v8 }
 0xcae   :  { %1228 = vmatpush3.bf16.msra.mxu1 %v1331_v12 }
 0xcaf   :  { %1229 = vmatprep.subr.bf16.mxu1 %v1527_v8 }
 0xcb0   :  { %v1478_v25 = vpop.eup %1477 }
 0xcb1   :  { %v919_v38 = vadd.f32 1.0, %v1478_v25 }
 0xcb2   :  { %v1480_v11 = vpop.eup %1479  ;;  %1230 = vmatpush3.bf16.msra.mxu1 %v1332_v4 }
 0xcb3   :  { %1483 = vrcp.f32 %v919_v38  ;;  %v920_v39 = vadd.f32 1.0, %v1480_v11  ;;  %v1482_v26 = vpop.eup %1481 }
 0xcb4   :  { %1485 = vtanh.f32 %v911_v7 }
 0xcb5   :  { %1487 = vrcp.f32 %v920_v39 }
 0xcb6   :  { %1489 = vpow2.f32 %v1205_v29 }
 0xcb7   :  { %1491 = vpow2.f32 %v1206_v5 }
 0xcbd   :  { %v1484_v15 = vpop.eup %1483 }
 0xcbe   :  { %v1486_v41 = vpop.eup %1485  ;;  %v941_v27 = vmul.f32 %v1484_v15, %v1482_v26  ;;  %v939_v34 = vmul.f32 %v1484_v15, %v1869_v57 }
 0xcbf   :  { %v1488_v16 = vpop.eup %1487 }
 0xcc0   :  { %945 = vrot.lane.b32.xlu0 %v941_v27, %s1526_s3  ;;  %v942_v17 = vmul.f32 %v1488_v16, %v1486_v41  ;;  %v1490_v28 = vpop.eup %1489  ;;  %v940_v18 = vmul.f32 %v1488_v16, %v1873_v22 }
 0xcc1   :  { %v1492_v33 = vpop.eup %1491  ;;  %v933_v30 = vadd.f32 1.0, %v1490_v28 }
 0xcc2   :  { %947 = vrot.lane.b32.xlu1 %v942_v17, %s1526_s3  ;;  %v934_v48 = vadd.f32 1.0, %v1492_v33 }
 0xcc3   :  { %1493 = vrcp.f32 %v933_v30 }
 0xccd   :  { %v1494_v32 = vpop.eup %1493 }
 0xd32   :  { %v946_v35 = vpop.permute.xlu0 %945 }
 0xd33   :  { %v1897_v31 = vadd.f32 %v946_v35, %v939_v34  ;;  %v1212_v34 = vld [vmem:[%s1946_s5] ss:$0 sm:$0xff] }
 0xd34   :  { %v948_v36 = vpop.permute.xlu1 %947 }
 0xd35   :  { %1495 = vtanh.f32 %v1897_v31  ;;  %v1901_v19 = vadd.f32 %v948_v36, %v940_v18 }
 0xd36   :  { %1497 = vrcp.f32 %v934_v48 }
 0xd37   :  { %1499 = vtanh.f32 %v1901_v19 }
 0xd3f   :  { %v1496_v53 = vpop.eup %1495 }
 0xd40   :  { %v1498_v40 = vpop.eup %1497  ;;  %v955_v50 = vmul.f32 %v1496_v53, %v1494_v32 }
 0xd41   :  { %v1500_v42 = vpop.eup %1499 }
 0xd42   :  { %v956_v51 = vmul.f32 %v1500_v42, %v1498_v40 }
 0xd44   :  { %v957_v52 = vpack.c.bf16 %v956_v51, %v955_v50 }
 0xd46   :  { %959 = vrot.lane.b32.xlu0 %v957_v52, %s1526_s3 }
 0xdb8   :  { %v960_v54 = vpop.permute.xlu0 %959 }
 0xdb9   :  { %1207 = vmatmul.mubr.msk.bf16.vlgmr.msra.gmra.mrb[20].mxu0 %vm302_vm1, %v960_v54 }
 0xe8c   :  { %v998_v57 = vpop.f32.mrb[20].mxu0 }
 0xe8d   :  { %v999_v60 = vadd.f32 %v998_v57, %v246_v0  ;;  %v1000_v22 = vpop.f32.mrb[21].mxu0 }
 0xe8e   :  { %v1001_v23 = vadd.f32 %v1000_v22, %v248_v56  ;;  %v1002_v62 = vpop.f32.mrb[22].mxu0 }
 0xe8f   :  { %v1208_v46 = vmul.f32 -1.442695, %v999_v60  ;;  %v1003_v21 = vadd.f32 %v1002_v62, %v250_v58  ;;  %v1004_v55 = vpop.f32.mrb[23].mxu0 }
 0xe90   :  { %v1005_v63 = vadd.f32 %v1004_v55, %v252_v61  ;;  %v1210_v13 = vmul.f32 -1.442695, %v1001_v23 }
 0xe91   :  { %1501 = vpow2.f32 %v1208_v46  ;;  %v1209_v43 = vmul.f32 -1.442695, %v1003_v21 }
 0xe92   :  { %v1211_v3 = vmul.f32 -1.442695, %v1005_v63 }
 0xe93   :  { %1503 = vpow2.f32 %v1209_v43 }
 0xe94   :  { %1505 = vtanh.f32 %v1001_v23 }
 0xe9b   :  { %v1502_v24 = vpop.eup %1501 }
 0xe9c   :  { %v1013_v44 = vadd.f32 1.0, %v1502_v24 }
 0xe9d   :  { %v1504_v20 = vpop.eup %1503 }
 0xe9e   :  { %1507 = vrcp.f32 %v1013_v44  ;;  %v1014_v45 = vadd.f32 1.0, %v1504_v20  ;;  %v1506_v49 = vpop.eup %1505 }
 0xe9f   :  { %1509 = vtanh.f32 %v1005_v63 }
 0xea0   :  { %1511 = vrcp.f32 %v1014_v45 }
 0xea1   :  { %1513 = vpow2.f32 %v1210_v13 }
 0xea2   :  { %1515 = vpow2.f32 %v1211_v3 }
 0xea8   :  { %v1508_v6 = vpop.eup %1507 }
 0xea9   :  { %v1510_v47 = vpop.eup %1509  ;;  %v1035_v59 = vmul.f32 %v1508_v6, %v1506_v49  ;;  %v1033_v25 = vmul.f32 %v1508_v6, %v1897_v31 }
 0xeaa   :  { %v1512_v2 = vpop.eup %1511 }
 0xeab   :  { %1039 = vrot.lane.b32.xlu1 %v1035_v59, %s1526_s3  ;;  %v1036_v1 = vmul.f32 %v1512_v2, %v1510_v47  ;;  %v1514_v14 = vpop.eup %1513  ;;  %v1034_v26 = vmul.f32 %v1512_v2, %v1901_v19 }
 0xeac   :  { %v1516_v7 = vpop.eup %1515  ;;  %v1027_v37 = vadd.f32 1.0, %v1514_v14 }
 0xead   :  { %1041 = vrot.lane.b32.xlu0 %v1036_v1, %s1526_s3  ;;  %v1028_v38 = vadd.f32 1.0, %v1516_v7 }
 0xeae   :  { %1517 = vrcp.f32 %v1027_v37 }
 0xeb8   :  { %v1518_v27 = vpop.eup %1517 }
 0xf1d   :  { %v1040_v11 = vpop.permute.xlu1 %1039 }
 0xf1e   :  { %v1045_v39 = vadd.f32 %v1040_v11, %v1033_v25 }
 0xf1f   :  { %v1042_v15 = vpop.permute.xlu0 %1041 }
 0xf20   :  { %1519 = vtanh.f32 %v1045_v39  ;;  %v1046_v41 = vadd.f32 %v1042_v15, %v1034_v26 }
 0xf21   :  { %1521 = vrcp.f32 %v1028_v38 }
 0xf22   :  { %1523 = vtanh.f32 %v1046_v41 }
 0xf2a   :  { %v1520_v16 = vpop.eup %1519 }
 0xf2b   :  { %v1522_v17 = vpop.eup %1521  ;;  %v1049_v29 = vmul.f32 %v1520_v16, %v1518_v27 }
 0xf2c   :  { %v1524_v5 = vpop.eup %1523 }
 0xf2d   :  { %v1050_v28 = vmul.f32 %v1524_v5, %v1522_v17 }
 0xf2f   :  { %v1051_v33 = vpack.c.bf16 %v1050_v28, %v1049_v29 }
 0xf31   :  { %1068 = vrot.lane.b32.xlu1 %v1051_v33, %s1526_s3 }
 0xfa3   :  { %v1069_v30 = vpop.permute.xlu1 %1068 }
 0xfa4   :  { %1232 = vmatmul.mubr.msk.bf16.vlgmr.msra.gmra.mrb[32].mxu1 %vm302_vm1, %v1069_v30 }
0x1077   :  { %v1131_v48 = vpop.f32.mrb[32].mxu1 }
0x1078   :  { %v1132_v35 = vadd.f32 %v1212_v34, %v1131_v48  ;;  %v1233_v31 = vpop.f32.mrb[33].mxu1 }
0x1079   :  { %v1134_v18 = vpop.f32.mrb[34].mxu1 }
0x107a   :  { %1139 = vst.msk [vmem:[%s1947_s6] sm:$0xff] %vm1138_vm3, %v1132_v35  ;;  %v1135_v36 = vadd.f32 %v1212_v34, %v1134_v18  ;;  %v1234_v19 = vpop.f32.mrb[35].mxu1 }
0x107c   :  { %1140 = vst.msk [vmem:[%s1947_s6 + $0x8] sm:$0xff] %vm1138_vm3, %v1135_v36 }

</bundles_post_ra>
